<compile_context>
chip_gen: v6e
topology: v6e:2x2x1
jax: 0.10.0
libtpu: 0.0.40
codegen_flags: <defaults>
</compile_context>

<pallas_src>
import jax
import jax.numpy as jnp
import numpy as np
from jax import lax
from jax.experimental import pallas as pl
from jax.experimental.pallas import tpu as pltpu

VOCAB = 64     # input_size
HIDDEN = 32    # hidden_size
LANES = 128    # TPU vreg lane width
TILE_ROWS = 8  # sublane depth of one vreg / output-store tile


def gru_seq_kernel(tok_ref, emb_ref, h0_ref, wih_ref, whh_ref, bih_ref, bhh_ref,
                   out_ref, x_scr, gi_scr, tile_scr):
    """Single grid step: full embedding gather + input projection + recurrence.

    tok_ref : (seq_pad,) int32 in SMEM (scalar prefetch)
    emb_ref : (V, Hp)   VMEM-resident embedding table (lane-padded)
    h0_ref  : (1, Hp)   initial hidden state (lane-padded)
    wih_ref : (Hp, 3Hp) W_ih^T, gate g in columns [g*Hp : g*Hp+H]
    whh_ref : (Hp, 3Hp) W_hh^T, same column layout
    bih_ref : (1, 3Hp)  b_ih (lane-padded per gate)
    bhh_ref : (1, 3Hp)  b_hh
    out_ref : (seq_pad, Hp) one hidden-state row per timestep
    x_scr   : (seq_pad, Hp)  gathered embeddings
    gi_scr  : (seq_pad, 3Hp) hoisted input-projection pre-activations
    tile_scr: (8, Hp)        batched output-store tile
    """
    seq_pad, Hp = out_ref.shape

    # ---- Phase 0: gather all embedding rows from the resident table --------
    def gather_body(t, carry):
        x_scr[pl.ds(t, 1), :] = emb_ref[pl.ds(tok_ref[t], 1), :]
        return carry
    lax.fori_loop(0, seq_pad, gather_body, 0)

    # ---- Phase 0b: hoisted, time-parallel input projection (one MXU pass) --
    gi_scr[...] = jnp.dot(x_scr[...], wih_ref[...],
                          preferred_element_type=jnp.float32) + bih_ref[...]

    # ---- Phase 1: sequential recurrence (only h @ W_hh^T on critical path) -
    n_tiles = seq_pad // TILE_ROWS

    def chunk_body(c, h):
        def step_body(i, h):
            t = c * TILE_ROWS + i
            gi = gi_scr[pl.ds(t, 1), :]                       # (1, 3Hp)
            gh = jnp.dot(h, whh_ref[...],
                         preferred_element_type=jnp.float32) + bhh_ref[...]
            # PyTorch nn.GRU gate order (r, z, n); r gates (W_hn h + b_hn).
            r = jax.nn.sigmoid(gi[:, 0:Hp] + gh[:, 0:Hp])
            z = jax.nn.sigmoid(gi[:, Hp:2 * Hp] + gh[:, Hp:2 * Hp])
            n = jnp.tanh(gi[:, 2 * Hp:3 * Hp] + r * gh[:, 2 * Hp:3 * Hp])
            h_new = (1.0 - z) * n + z * h                     # padded lanes stay 0
            tile_scr[pl.ds(i, 1), :] = h_new
            return h_new

        h = lax.fori_loop(0, TILE_ROWS, step_body, h, unroll=True)
        # One dense (8, 128) store instead of 8 masked (1, 128) stores.
        row0 = pl.multiple_of(c * TILE_ROWS, TILE_ROWS)
        out_ref[pl.ds(row0, TILE_ROWS), :] = tile_scr[...]
        return h

    lax.fori_loop(0, n_tiles, chunk_body, h0_ref[...])


def init_params(key, vocab, hidden):
    """Deterministic parameter init mimicking nn.Embedding / nn.GRU shapes."""
    k_emb, k_wih, k_whh, k_bih, k_bhh = jax.random.split(key, 5)
    bound = 1.0 / np.sqrt(hidden)
    emb = jax.random.normal(k_emb, (vocab, hidden), jnp.float32)
    w_ih = jax.random.uniform(k_wih, (3 * hidden, hidden), jnp.float32, -bound, bound)
    w_hh = jax.random.uniform(k_whh, (3 * hidden, hidden), jnp.float32, -bound, bound)
    b_ih = jax.random.uniform(k_bih, (3 * hidden,), jnp.float32, -bound, bound)
    b_hh = jax.random.uniform(k_bhh, (3 * hidden,), jnp.float32, -bound, bound)
    return emb, w_ih, w_hh, b_ih, b_hh


def prepare_params(params):
    """One-time prep: transpose, lane-pad each gate block to 128 columns.

    Layout of each (Hp, 3Hp) weight: rows [0:H] x cols [g*Hp : g*Hp+H] hold
    W^T for gate g; everything else is zero, so padded lanes never leak into
    real lanes (padded gate pre-activations are exactly 0).
    """
    emb, w_ih, w_hh, b_ih, b_hh = params
    V, H = emb.shape
    Hp = LANES * pl.cdiv(H, LANES)

    emb_p = jnp.zeros((V, Hp), jnp.float32).at[:, :H].set(emb.astype(jnp.float32))

    w_ih_t = jnp.transpose(w_ih).astype(jnp.float32)   # (H, 3H)
    w_hh_t = jnp.transpose(w_hh).astype(jnp.float32)   # (H, 3H)

    wih_p = jnp.zeros((Hp, 3 * Hp), jnp.float32)
    whh_p = jnp.zeros((Hp, 3 * Hp), jnp.float32)
    bih_p = jnp.zeros((1, 3 * Hp), jnp.float32)
    bhh_p = jnp.zeros((1, 3 * Hp), jnp.float32)
    for g in range(3):
        wih_p = wih_p.at[:H, g * Hp:g * Hp + H].set(w_ih_t[:, g * H:(g + 1) * H])
        whh_p = whh_p.at[:H, g * Hp:g * Hp + H].set(w_hh_t[:, g * H:(g + 1) * H])
        bih_p = bih_p.at[0, g * Hp:g * Hp + H].set(b_ih[g * H:(g + 1) * H].astype(jnp.float32))
        bhh_p = bhh_p.at[0, g * Hp:g * Hp + H].set(b_hh[g * H:(g + 1) * H].astype(jnp.float32))

    return emb_p, wih_p, whh_p, bih_p, bhh_p, H, Hp


def encoder_rnn_forward(tokens, hidden, prepared):
    """Runs EncoderRNN.forward over a whole token sequence in ONE pallas_call.

    tokens:  (seq,) int32 token ids (seq=1 reproduces a single forward() call)
    hidden:  (1, 1, H) float32 initial hidden state
    returns (outputs (seq, 1, H), hidden (1, 1, H))
    """
    emb_p, wih_p, whh_p, bih_p, bhh_p, H, Hp = prepared
    V = emb_p.shape[0]

    tokens = jnp.asarray(tokens, dtype=jnp.int32).reshape(-1)
    seq_len = int(tokens.shape[0])
    seq_pad = TILE_ROWS * pl.cdiv(seq_len, TILE_ROWS)

    # Pad token ids with a valid id (0); padded rows are trimmed below and the
    # hidden state is read from row seq_len-1, so pad steps never matter.
    tok_p = jnp.zeros((seq_pad,), jnp.int32).at[:seq_len].set(tokens)

    h0 = jnp.zeros((1, Hp), jnp.float32).at[:, :H].set(
        hidden.reshape(1, H).astype(jnp.float32))

    grid_spec = pltpu.PrefetchScalarGridSpec(
        num_scalar_prefetch=1,
        grid=(1,),
        in_specs=[
            pl.BlockSpec((V, Hp), lambda i, tok: (0, 0)),           # emb table (resident)
            pl.BlockSpec((1, Hp), lambda i, tok: (0, 0)),           # h0
            pl.BlockSpec((Hp, 3 * Hp), lambda i, tok: (0, 0)),      # W_ih^T
            pl.BlockSpec((Hp, 3 * Hp), lambda i, tok: (0, 0)),      # W_hh^T
            pl.BlockSpec((1, 3 * Hp), lambda i, tok: (0, 0)),       # b_ih
            pl.BlockSpec((1, 3 * Hp), lambda i, tok: (0, 0)),       # b_hh
        ],
        out_specs=pl.BlockSpec((seq_pad, Hp), lambda i, tok: (0, 0)),
        scratch_shapes=[
            pltpu.VMEM((seq_pad, Hp), jnp.float32),                 # gathered embeddings
            pltpu.VMEM((seq_pad, 3 * Hp), jnp.float32),             # hoisted gi
            pltpu.VMEM((TILE_ROWS, Hp), jnp.float32),               # output-store tile
        ],
    )

    out_p = pl.pallas_call(
        gru_seq_kernel,
        out_shape=jax.ShapeDtypeStruct((seq_pad, Hp), jnp.float32),
        grid_spec=grid_spec,
        compiler_params=pltpu.CompilerParams(
            dimension_semantics=("arbitrary",)),    # single step, sequential inside
    )(tok_p, emb_p, h0, wih_p, whh_p, bih_p, bhh_p)

    outputs = out_p[:seq_len, :H].reshape(seq_len, 1, H)
    hidden_new = out_p[seq_len - 1:seq_len, :H].reshape(1, 1, H)
    return outputs, hidden_new


def reference_forward(tokens, hidden, params):
    """Pure-JAX reference of looping EncoderRNN.forward over the sequence."""
    emb, w_ih, w_hh, b_ih, b_hh = params
    H = emb.shape[1]
    h = hidden.reshape(1, H)
    outs = []
    for tok in np.asarray(tokens):
        x = emb[int(tok)].reshape(1, H)
        gi = x @ w_ih.T + b_ih
        gh = h @ w_hh.T + b_hh
        i_r, i_z, i_n = gi[:, 0:H], gi[:, H:2 * H], gi[:, 2 * H:3 * H]
        h_r, h_z, h_n = gh[:, 0:H], gh[:, H:2 * H], gh[:, 2 * H:3 * H]
        r = jax.nn.sigmoid(i_r + h_r)
        z = jax.nn.sigmoid(i_z + h_z)
        n = jnp.tanh(i_n + r * h_n)
        h = (1.0 - z) * n + z * h
        outs.append(h)
    return (jnp.stack(outs).reshape(len(outs), 1, H), h.reshape(1, 1, H))


if __name__ == "__main__":
    key = jax.random.PRNGKey(0)
    params = init_params(key, VOCAB, HIDDEN)
    prepared = prepare_params(params)          # one-time: transpose/pad

    SEQ = 8
    tokens = jax.random.randint(jax.random.PRNGKey(1), (SEQ,), 0, VOCAB, jnp.int32)
    hidden0 = jnp.zeros((1, 1, HIDDEN), jnp.float32)   # initHidden()

    # Fused whole-sequence run (the perf-critical path)
    outputs, h_new = encoder_rnn_forward(tokens, hidden0, prepared)
    outputs = jax.block_until_ready(outputs)
    h_new = jax.block_until_ready(h_new)

    out_ref, h_ref = reference_forward(tokens, hidden0, params)
    assert outputs.shape == (SEQ, 1, HIDDEN) and h_new.shape == (1, 1, HIDDEN)
    np.testing.assert_allclose(np.asarray(outputs), np.asarray(out_ref),
                               rtol=1e-5, atol=1e-5)
    np.testing.assert_allclose(np.asarray(h_new), np.asarray(h_ref),
                               rtol=1e-5, atol=1e-5)

    # Single-token call: exactly EncoderRNN.forward(input, hidden)
    out1, h1 = encoder_rnn_forward(tokens[:1], hidden0, prepared)
    out1 = jax.block_until_ready(out1)
    out1_ref, h1_ref = reference_forward(tokens[:1], hidden0, params)
    np.testing.assert_allclose(np.asarray(out1), np.asarray(out1_ref),
                               rtol=1e-5, atol=1e-5)
    np.testing.assert_allclose(np.asarray(h1), np.asarray(h1_ref),
                               rtol=1e-5, atol=1e-5)

    print("KERNEL_OK")
</pallas_src>

<mosaic_0001>
module attributes {stable_mosaic.version = 11 : i64} {
  func.func @gru_seq_kernel(%arg0: i32, %arg1: memref<8xi32, #tpu.memory_space<smem>>, %arg2: memref<64x128xf32, #tpu.memory_space<vmem>>, %arg3: memref<1x128xf32, #tpu.memory_space<vmem>>, %arg4: memref<128x384xf32, #tpu.memory_space<vmem>>, %arg5: memref<128x384xf32, #tpu.memory_space<vmem>>, %arg6: memref<1x384xf32, #tpu.memory_space<vmem>>, %arg7: memref<1x384xf32, #tpu.memory_space<vmem>>, %arg8: memref<8x128xf32, #tpu.memory_space<vmem>>, %arg9: memref<8x128xf32, #tpu.memory_space<vmem>>, %arg10: memref<8x384xf32, #tpu.memory_space<vmem>>, %arg11: memref<8x128xf32, #tpu.memory_space<vmem>>) attributes {dimension_semantics = [#tpu.dimension_semantics<arbitrary>], iteration_bounds = array<i64: 1>, scalar_prefetch = 1 : i64, scratch_operands = 3 : i64, tpu.core_type = #tpu.core_type<tc>, window_params = [{pipeline_mode = #tpu.pipeline_mode<synchronous>, transform_indices = @transform_0, window_bounds = array<i64: 64, 128>}, {pipeline_mode = #tpu.pipeline_mode<synchronous>, transform_indices = @transform_1, window_bounds = array<i64: 1, 128>}, {pipeline_mode = #tpu.pipeline_mode<synchronous>, transform_indices = @transform_2, window_bounds = array<i64: 128, 384>}, {pipeline_mode = #tpu.pipeline_mode<synchronous>, transform_indices = @transform_3, window_bounds = array<i64: 128, 384>}, {pipeline_mode = #tpu.pipeline_mode<synchronous>, transform_indices = @transform_4, window_bounds = array<i64: 1, 384>}, {pipeline_mode = #tpu.pipeline_mode<synchronous>, transform_indices = @transform_5, window_bounds = array<i64: 1, 384>}, {pipeline_mode = #tpu.pipeline_mode<synchronous>, transform_indices = @transform_6, window_bounds = array<i64: 8, 128>}]} {
    %c0_i32 = arith.constant 0 : i32
    %c8_i32 = arith.constant 8 : i32
    %0 = arith.addi %c0_i32, %c8_i32 : i32
    %c1_i32 = arith.constant 1 : i32
    scf.for %arg12 = %c0_i32 to %0 step %c1_i32  : i32 {
      %302 = arith.index_cast %arg12 : i32 to index
      %303 = memref.load %arg1[%302] : memref<8xi32, #tpu.memory_space<smem>>
      %304 = arith.index_cast %303 : i32 to index
      %c0_107 = arith.constant 0 : index
      %305 = vector.load %arg2[%304, %c0_107] : memref<64x128xf32, #tpu.memory_space<vmem>>, vector<1x128xf32>
      %306 = arith.index_cast %arg12 : i32 to index
      %c0_108 = arith.constant 0 : index
      %307 = vector.load %arg9[%306, %c0_108] : memref<8x128xf32, #tpu.memory_space<vmem>>, vector<1x128xf32>
      tpu.vector_store %arg9[%306, %c0_108], %305 {strides = array<i32>} : memref<8x128xf32, #tpu.memory_space<vmem>>, vector<1x128xf32>,
    }
    %c8_i32_0 = arith.constant 8 : i32
    %c0 = arith.constant 0 : index
    %c0_1 = arith.constant 0 : index
    %1 = vector.load %arg9[%c0, %c0_1] : memref<8x128xf32, #tpu.memory_space<vmem>>, vector<8x128xf32>
    %c0_2 = arith.constant 0 : index
    %c0_3 = arith.constant 0 : index
    %2 = vector.load %arg4[%c0_2, %c0_3] : memref<128x384xf32, #tpu.memory_space<vmem>>, vector<128x384xf32>
    %cst = arith.constant dense<0.000000e+00> : vector<8x384xf32>
    %3 = tpu.matmul %1, %2, %cst {dimension_numbers = #tpu.dot_dimension_numbers<[1], [0], [0], [1], [0, 0, 1, 1], [], []>} : vector<8x128xf32>, vector<128x384xf32>, vector<8x384xf32> -> vector<8x384xf32>
    %c0_4 = arith.constant 0 : index
    %c0_5 = arith.constant 0 : index
    %4 = vector.load %arg6[%c0_4, %c0_5] : memref<1x384xf32, #tpu.memory_space<vmem>>, vector<1x384xf32>
    %5 = vector.broadcast %4 : vector<1x384xf32> to vector<8x384xf32>
    %6 = arith.addf %3, %5 : vector<8x384xf32>
    %c0_6 = arith.constant 0 : index
    %c0_7 = arith.constant 0 : index
    %7 = vector.load %arg10[%c0_6, %c0_7] : memref<8x384xf32, #tpu.memory_space<vmem>>, vector<8x384xf32>
    tpu.vector_store %arg10[%c0_6, %c0_7], %6 {strides = array<i32>} : memref<8x384xf32, #tpu.memory_space<vmem>>, vector<8x384xf32>,
    %c0_8 = arith.constant 0 : index
    %c0_9 = arith.constant 0 : index
    %8 = vector.load %arg3[%c0_8, %c0_9] : memref<1x128xf32, #tpu.memory_space<vmem>>, vector<1x128xf32>
    %c0_i32_10 = arith.constant 0 : i32
    %c0_i32_11 = arith.constant 0 : i32
    %c8_i32_12 = arith.constant 8 : i32
    %9 = arith.muli %c0_i32_10, %c8_i32_12 : i32
    %10 = arith.addi %9, %c0_i32_11 : i32
    %11 = arith.index_cast %10 : i32 to index
    %c0_13 = arith.constant 0 : index
    %12 = vector.load %arg10[%11, %c0_13] : memref<8x384xf32, #tpu.memory_space<vmem>>, vector<1x384xf32>
    %c0_14 = arith.constant 0 : index
    %c0_15 = arith.constant 0 : index
    %13 = vector.load %arg5[%c0_14, %c0_15] : memref<128x384xf32, #tpu.memory_space<vmem>>, vector<128x384xf32>
    %cst_16 = arith.constant dense<0.000000e+00> : vector<1x384xf32>
    %14 = tpu.matmul %8, %13, %cst_16 {dimension_numbers = #tpu.dot_dimension_numbers<[1], [0], [0], [1], [0, 0, 1, 1], [], []>} : vector<1x128xf32>, vector<128x384xf32>, vector<1x384xf32> -> vector<1x384xf32>
    %c0_17 = arith.constant 0 : index
    %c0_18 = arith.constant 0 : index
    %15 = vector.load %arg7[%c0_17, %c0_18] : memref<1x384xf32, #tpu.memory_space<vmem>>, vector<1x384xf32>
    %16 = arith.addf %14, %15 : vector<1x384xf32>
    %17 = vector.extract_strided_slice %12 {offsets = [0, 0], sizes = [1, 128], strides = [1, 1]} : vector<1x384xf32> to vector<1x128xf32>
    %18 = vector.extract_strided_slice %16 {offsets = [0, 0], sizes = [1, 128], strides = [1, 1]} : vector<1x384xf32> to vector<1x128xf32>
    %19 = arith.addf %17, %18 : vector<1x128xf32>
    %20 = arith.negf %19 : vector<1x128xf32>
    %21 = math.exp %20 : vector<1x128xf32>
    %cst_19 = arith.constant 1.000000e+00 : f32
    %22 = vector.broadcast %cst_19 : f32 to vector<1x128xf32>
    %23 = arith.addf %22, %21 : vector<1x128xf32>
    %24 = arith.divf %22, %23 : vector<1x128xf32>
    %25 = vector.extract_strided_slice %12 {offsets = [0, 128], sizes = [1, 128], strides = [1, 1]} : vector<1x384xf32> to vector<1x128xf32>
    %26 = vector.extract_strided_slice %16 {offsets = [0, 128], sizes = [1, 128], strides = [1, 1]} : vector<1x384xf32> to vector<1x128xf32>
    %27 = arith.addf %25, %26 : vector<1x128xf32>
    %28 = arith.negf %27 : vector<1x128xf32>
    %29 = math.exp %28 : vector<1x128xf32>
    %cst_20 = arith.constant 1.000000e+00 : f32
    %30 = vector.broadcast %cst_20 : f32 to vector<1x128xf32>
    %31 = arith.addf %30, %29 : vector<1x128xf32>
    %32 = arith.divf %30, %31 : vector<1x128xf32>
    %33 = vector.extract_strided_slice %12 {offsets = [0, 256], sizes = [1, 128], strides = [1, 1]} : vector<1x384xf32> to vector<1x128xf32>
    %34 = vector.extract_strided_slice %16 {offsets = [0, 256], sizes = [1, 128], strides = [1, 1]} : vector<1x384xf32> to vector<1x128xf32>
    %35 = arith.mulf %24, %34 : vector<1x128xf32>
    %36 = arith.addf %33, %35 : vector<1x128xf32>
    %37 = math.tanh %36 : vector<1x128xf32>
    %cst_21 = arith.constant 1.000000e+00 : f32
    %38 = vector.broadcast %cst_21 : f32 to vector<1x128xf32>
    %39 = arith.subf %38, %32 : vector<1x128xf32>
    %40 = arith.mulf %39, %37 : vector<1x128xf32>
    %41 = arith.mulf %32, %8 : vector<1x128xf32>
    %42 = arith.addf %40, %41 : vector<1x128xf32>
    %43 = arith.index_cast %c0_i32_11 : i32 to index
    %c0_22 = arith.constant 0 : index
    %44 = vector.load %arg11[%43, %c0_22] : memref<8x128xf32, #tpu.memory_space<vmem>>, vector<1x128xf32>
    tpu.vector_store %arg11[%43, %c0_22], %42 {strides = array<i32>} : memref<8x128xf32, #tpu.memory_space<vmem>>, vector<1x128xf32>,
    %c1_i32_23 = arith.constant 1 : i32
    %c8_i32_24 = arith.constant 8 : i32
    %45 = arith.muli %c0_i32_10, %c8_i32_24 : i32
    %46 = arith.addi %45, %c1_i32_23 : i32
    %47 = arith.index_cast %46 : i32 to index
    %c0_25 = arith.constant 0 : index
    %48 = vector.load %arg10[%47, %c0_25] : memref<8x384xf32, #tpu.memory_space<vmem>>, vector<1x384xf32>
    %c0_26 = arith.constant 0 : index
    %c0_27 = arith.constant 0 : index
    %49 = vector.load %arg5[%c0_26, %c0_27] : memref<128x384xf32, #tpu.memory_space<vmem>>, vector<128x384xf32>
    %cst_28 = arith.constant dense<0.000000e+00> : vector<1x384xf32>
    %50 = tpu.matmul %42, %49, %cst_28 {dimension_numbers = #tpu.dot_dimension_numbers<[1], [0], [0], [1], [0, 0, 1, 1], [], []>} : vector<1x128xf32>, vector<128x384xf32>, vector<1x384xf32> -> vector<1x384xf32>
    %c0_29 = arith.constant 0 : index
    %c0_30 = arith.constant 0 : index
    %51 = vector.load %arg7[%c0_29, %c0_30] : memref<1x384xf32, #tpu.memory_space<vmem>>, vector<1x384xf32>
    %52 = arith.addf %50, %51 : vector<1x384xf32>
    %53 = vector.extract_strided_slice %48 {offsets = [0, 0], sizes = [1, 128], strides = [1, 1]} : vector<1x384xf32> to vector<1x128xf32>
    %54 = vector.extract_strided_slice %52 {offsets = [0, 0], sizes = [1, 128], strides = [1, 1]} : vector<1x384xf32> to vector<1x128xf32>
    %55 = arith.addf %53, %54 : vector<1x128xf32>
    %56 = arith.negf %55 : vector<1x128xf32>
    %57 = math.exp %56 : vector<1x128xf32>
    %cst_31 = arith.constant 1.000000e+00 : f32
    %58 = vector.broadcast %cst_31 : f32 to vector<1x128xf32>
    %59 = arith.addf %58, %57 : vector<1x128xf32>
    %60 = arith.divf %58, %59 : vector<1x128xf32>
    %61 = vector.extract_strided_slice %48 {offsets = [0, 128], sizes = [1, 128], strides = [1, 1]} : vector<1x384xf32> to vector<1x128xf32>
    %62 = vector.extract_strided_slice %52 {offsets = [0, 128], sizes = [1, 128], strides = [1, 1]} : vector<1x384xf32> to vector<1x128xf32>
    %63 = arith.addf %61, %62 : vector<1x128xf32>
    %64 = arith.negf %63 : vector<1x128xf32>
    %65 = math.exp %64 : vector<1x128xf32>
    %cst_32 = arith.constant 1.000000e+00 : f32
    %66 = vector.broadcast %cst_32 : f32 to vector<1x128xf32>
    %67 = arith.addf %66, %65 : vector<1x128xf32>
    %68 = arith.divf %66, %67 : vector<1x128xf32>
    %69 = vector.extract_strided_slice %48 {offsets = [0, 256], sizes = [1, 128], strides = [1, 1]} : vector<1x384xf32> to vector<1x128xf32>
    %70 = vector.extract_strided_slice %52 {offsets = [0, 256], sizes = [1, 128], strides = [1, 1]} : vector<1x384xf32> to vector<1x128xf32>
    %71 = arith.mulf %60, %70 : vector<1x128xf32>
    %72 = arith.addf %69, %71 : vector<1x128xf32>
    %73 = math.tanh %72 : vector<1x128xf32>
    %cst_33 = arith.constant 1.000000e+00 : f32
    %74 = vector.broadcast %cst_33 : f32 to vector<1x128xf32>
    %75 = arith.subf %74, %68 : vector<1x128xf32>
    %76 = arith.mulf %75, %73 : vector<1x128xf32>
    %77 = arith.mulf %68, %42 : vector<1x128xf32>
    %78 = arith.addf %76, %77 : vector<1x128xf32>
    %79 = arith.index_cast %c1_i32_23 : i32 to index
    %c0_34 = arith.constant 0 : index
    %80 = vector.load %arg11[%79, %c0_34] : memref<8x128xf32, #tpu.memory_space<vmem>>, vector<1x128xf32>
    tpu.vector_store %arg11[%79, %c0_34], %78 {strides = array<i32>} : memref<8x128xf32, #tpu.memory_space<vmem>>, vector<1x128xf32>,
    %c2_i32 = arith.constant 2 : i32
    %c8_i32_35 = arith.constant 8 : i32
    %81 = arith.muli %c0_i32_10, %c8_i32_35 : i32
    %82 = arith.addi %81, %c2_i32 : i32
    %83 = arith.index_cast %82 : i32 to index
    %c0_36 = arith.constant 0 : index
    %84 = vector.load %arg10[%83, %c0_36] : memref<8x384xf32, #tpu.memory_space<vmem>>, vector<1x384xf32>
    %c0_37 = arith.constant 0 : index
    %c0_38 = arith.constant 0 : index
    %85 = vector.load %arg5[%c0_37, %c0_38] : memref<128x384xf32, #tpu.memory_space<vmem>>, vector<128x384xf32>
    %cst_39 = arith.constant dense<0.000000e+00> : vector<1x384xf32>
    %86 = tpu.matmul %78, %85, %cst_39 {dimension_numbers = #tpu.dot_dimension_numbers<[1], [0], [0], [1], [0, 0, 1, 1], [], []>} : vector<1x128xf32>, vector<128x384xf32>, vector<1x384xf32> -> vector<1x384xf32>
    %c0_40 = arith.constant 0 : index
    %c0_41 = arith.constant 0 : index
    %87 = vector.load %arg7[%c0_40, %c0_41] : memref<1x384xf32, #tpu.memory_space<vmem>>, vector<1x384xf32>
    %88 = arith.addf %86, %87 : vector<1x384xf32>
    %89 = vector.extract_strided_slice %84 {offsets = [0, 0], sizes = [1, 128], strides = [1, 1]} : vector<1x384xf32> to vector<1x128xf32>
    %90 = vector.extract_strided_slice %88 {offsets = [0, 0], sizes = [1, 128], strides = [1, 1]} : vector<1x384xf32> to vector<1x128xf32>
    %91 = arith.addf %89, %90 : vector<1x128xf32>
    %92 = arith.negf %91 : vector<1x128xf32>
    %93 = math.exp %92 : vector<1x128xf32>
    %cst_42 = arith.constant 1.000000e+00 : f32
    %94 = vector.broadcast %cst_42 : f32 to vector<1x128xf32>
    %95 = arith.addf %94, %93 : vector<1x128xf32>
    %96 = arith.divf %94, %95 : vector<1x128xf32>
    %97 = vector.extract_strided_slice %84 {offsets = [0, 128], sizes = [1, 128], strides = [1, 1]} : vector<1x384xf32> to vector<1x128xf32>
    %98 = vector.extract_strided_slice %88 {offsets = [0, 128], sizes = [1, 128], strides = [1, 1]} : vector<1x384xf32> to vector<1x128xf32>
    %99 = arith.addf %97, %98 : vector<1x128xf32>
    %100 = arith.negf %99 : vector<1x128xf32>
    %101 = math.exp %100 : vector<1x128xf32>
    %cst_43 = arith.constant 1.000000e+00 : f32
    %102 = vector.broadcast %cst_43 : f32 to vector<1x128xf32>
    %103 = arith.addf %102, %101 : vector<1x128xf32>
    %104 = arith.divf %102, %103 : vector<1x128xf32>
    %105 = vector.extract_strided_slice %84 {offsets = [0, 256], sizes = [1, 128], strides = [1, 1]} : vector<1x384xf32> to vector<1x128xf32>
    %106 = vector.extract_strided_slice %88 {offsets = [0, 256], sizes = [1, 128], strides = [1, 1]} : vector<1x384xf32> to vector<1x128xf32>
    %107 = arith.mulf %96, %106 : vector<1x128xf32>
    %108 = arith.addf %105, %107 : vector<1x128xf32>
    %109 = math.tanh %108 : vector<1x128xf32>
    %cst_44 = arith.constant 1.000000e+00 : f32
    %110 = vector.broadcast %cst_44 : f32 to vector<1x128xf32>
    %111 = arith.subf %110, %104 : vector<1x128xf32>
    %112 = arith.mulf %111, %109 : vector<1x128xf32>
    %113 = arith.mulf %104, %78 : vector<1x128xf32>
    %114 = arith.addf %112, %113 : vector<1x128xf32>
    %115 = arith.index_cast %c2_i32 : i32 to index
    %c0_45 = arith.constant 0 : index
    %116 = vector.load %arg11[%115, %c0_45] : memref<8x128xf32, #tpu.memory_space<vmem>>, vector<1x128xf32>
    tpu.vector_store %arg11[%115, %c0_45], %114 {strides = array<i32>} : memref<8x128xf32, #tpu.memory_space<vmem>>, vector<1x128xf32>,
    %c3_i32 = arith.constant 3 : i32
    %c8_i32_46 = arith.constant 8 : i32
    %117 = arith.muli %c0_i32_10, %c8_i32_46 : i32
    %118 = arith.addi %117, %c3_i32 : i32
    %119 = arith.index_cast %118 : i32 to index
    %c0_47 = arith.constant 0 : index
    %120 = vector.load %arg10[%119, %c0_47] : memref<8x384xf32, #tpu.memory_space<vmem>>, vector<1x384xf32>
    %c0_48 = arith.constant 0 : index
    %c0_49 = arith.constant 0 : index
    %121 = vector.load %arg5[%c0_48, %c0_49] : memref<128x384xf32, #tpu.memory_space<vmem>>, vector<128x384xf32>
    %cst_50 = arith.constant dense<0.000000e+00> : vector<1x384xf32>
    %122 = tpu.matmul %114, %121, %cst_50 {dimension_numbers = #tpu.dot_dimension_numbers<[1], [0], [0], [1], [0, 0, 1, 1], [], []>} : vector<1x128xf32>, vector<128x384xf32>, vector<1x384xf32> -> vector<1x384xf32>
    %c0_51 = arith.constant 0 : index
    %c0_52 = arith.constant 0 : index
    %123 = vector.load %arg7[%c0_51, %c0_52] : memref<1x384xf32, #tpu.memory_space<vmem>>, vector<1x384xf32>
    %124 = arith.addf %122, %123 : vector<1x384xf32>
    %125 = vector.extract_strided_slice %120 {offsets = [0, 0], sizes = [1, 128], strides = [1, 1]} : vector<1x384xf32> to vector<1x128xf32>
    %126 = vector.extract_strided_slice %124 {offsets = [0, 0], sizes = [1, 128], strides = [1, 1]} : vector<1x384xf32> to vector<1x128xf32>
    %127 = arith.addf %125, %126 : vector<1x128xf32>
    %128 = arith.negf %127 : vector<1x128xf32>
    %129 = math.exp %128 : vector<1x128xf32>
    %cst_53 = arith.constant 1.000000e+00 : f32
    %130 = vector.broadcast %cst_53 : f32 to vector<1x128xf32>
    %131 = arith.addf %130, %129 : vector<1x128xf32>
    %132 = arith.divf %130, %131 : vector<1x128xf32>
    %133 = vector.extract_strided_slice %120 {offsets = [0, 128], sizes = [1, 128], strides = [1, 1]} : vector<1x384xf32> to vector<1x128xf32>
    %134 = vector.extract_strided_slice %124 {offsets = [0, 128], sizes = [1, 128], strides = [1, 1]} : vector<1x384xf32> to vector<1x128xf32>
    %135 = arith.addf %133, %134 : vector<1x128xf32>
    %136 = arith.negf %135 : vector<1x128xf32>
    %137 = math.exp %136 : vector<1x128xf32>
    %cst_54 = arith.constant 1.000000e+00 : f32
    %138 = vector.broadcast %cst_54 : f32 to vector<1x128xf32>
    %139 = arith.addf %138, %137 : vector<1x128xf32>
    %140 = arith.divf %138, %139 : vector<1x128xf32>
    %141 = vector.extract_strided_slice %120 {offsets = [0, 256], sizes = [1, 128], strides = [1, 1]} : vector<1x384xf32> to vector<1x128xf32>
    %142 = vector.extract_strided_slice %124 {offsets = [0, 256], sizes = [1, 128], strides = [1, 1]} : vector<1x384xf32> to vector<1x128xf32>
    %143 = arith.mulf %132, %142 : vector<1x128xf32>
    %144 = arith.addf %141, %143 : vector<1x128xf32>
    %145 = math.tanh %144 : vector<1x128xf32>
    %cst_55 = arith.constant 1.000000e+00 : f32
    %146 = vector.broadcast %cst_55 : f32 to vector<1x128xf32>
    %147 = arith.subf %146, %140 : vector<1x128xf32>
    %148 = arith.mulf %147, %145 : vector<1x128xf32>
    %149 = arith.mulf %140, %114 : vector<1x128xf32>
    %150 = arith.addf %148, %149 : vector<1x128xf32>
    %151 = arith.index_cast %c3_i32 : i32 to index
    %c0_56 = arith.constant 0 : index
    %152 = vector.load %arg11[%151, %c0_56] : memref<8x128xf32, #tpu.memory_space<vmem>>, vector<1x128xf32>
    tpu.vector_store %arg11[%151, %c0_56], %150 {strides = array<i32>} : memref<8x128xf32, #tpu.memory_space<vmem>>, vector<1x128xf32>,
    %c4_i32 = arith.constant 4 : i32
    %c8_i32_57 = arith.constant 8 : i32
    %153 = arith.muli %c0_i32_10, %c8_i32_57 : i32
    %154 = arith.addi %153, %c4_i32 : i32
    %155 = arith.index_cast %154 : i32 to index
    %c0_58 = arith.constant 0 : index
    %156 = vector.load %arg10[%155, %c0_58] : memref<8x384xf32, #tpu.memory_space<vmem>>, vector<1x384xf32>
    %c0_59 = arith.constant 0 : index
    %c0_60 = arith.constant 0 : index
    %157 = vector.load %arg5[%c0_59, %c0_60] : memref<128x384xf32, #tpu.memory_space<vmem>>, vector<128x384xf32>
    %cst_61 = arith.constant dense<0.000000e+00> : vector<1x384xf32>
    %158 = tpu.matmul %150, %157, %cst_61 {dimension_numbers = #tpu.dot_dimension_numbers<[1], [0], [0], [1], [0, 0, 1, 1], [], []>} : vector<1x128xf32>, vector<128x384xf32>, vector<1x384xf32> -> vector<1x384xf32>
    %c0_62 = arith.constant 0 : index
    %c0_63 = arith.constant 0 : index
    %159 = vector.load %arg7[%c0_62, %c0_63] : memref<1x384xf32, #tpu.memory_space<vmem>>, vector<1x384xf32>
    %160 = arith.addf %158, %159 : vector<1x384xf32>
    %161 = vector.extract_strided_slice %156 {offsets = [0, 0], sizes = [1, 128], strides = [1, 1]} : vector<1x384xf32> to vector<1x128xf32>
    %162 = vector.extract_strided_slice %160 {offsets = [0, 0], sizes = [1, 128], strides = [1, 1]} : vector<1x384xf32> to vector<1x128xf32>
    %163 = arith.addf %161, %162 : vector<1x128xf32>
    %164 = arith.negf %163 : vector<1x128xf32>
    %165 = math.exp %164 : vector<1x128xf32>
    %cst_64 = arith.constant 1.000000e+00 : f32
    %166 = vector.broadcast %cst_64 : f32 to vector<1x128xf32>
    %167 = arith.addf %166, %165 : vector<1x128xf32>
    %168 = arith.divf %166, %167 : vector<1x128xf32>
    %169 = vector.extract_strided_slice %156 {offsets = [0, 128], sizes = [1, 128], strides = [1, 1]} : vector<1x384xf32> to vector<1x128xf32>
    %170 = vector.extract_strided_slice %160 {offsets = [0, 128], sizes = [1, 128], strides = [1, 1]} : vector<1x384xf32> to vector<1x128xf32>
    %171 = arith.addf %169, %170 : vector<1x128xf32>
    %172 = arith.negf %171 : vector<1x128xf32>
    %173 = math.exp %172 : vector<1x128xf32>
    %cst_65 = arith.constant 1.000000e+00 : f32
    %174 = vector.broadcast %cst_65 : f32 to vector<1x128xf32>
    %175 = arith.addf %174, %173 : vector<1x128xf32>
    %176 = arith.divf %174, %175 : vector<1x128xf32>
    %177 = vector.extract_strided_slice %156 {offsets = [0, 256], sizes = [1, 128], strides = [1, 1]} : vector<1x384xf32> to vector<1x128xf32>
    %178 = vector.extract_strided_slice %160 {offsets = [0, 256], sizes = [1, 128], strides = [1, 1]} : vector<1x384xf32> to vector<1x128xf32>
    %179 = arith.mulf %168, %178 : vector<1x128xf32>
    %180 = arith.addf %177, %179 : vector<1x128xf32>
    %181 = math.tanh %180 : vector<1x128xf32>
    %cst_66 = arith.constant 1.000000e+00 : f32
    %182 = vector.broadcast %cst_66 : f32 to vector<1x128xf32>
    %183 = arith.subf %182, %176 : vector<1x128xf32>
    %184 = arith.mulf %183, %181 : vector<1x128xf32>
    %185 = arith.mulf %176, %150 : vector<1x128xf32>
    %186 = arith.addf %184, %185 : vector<1x128xf32>
    %187 = arith.index_cast %c4_i32 : i32 to index
    %c0_67 = arith.constant 0 : index
    %188 = vector.load %arg11[%187, %c0_67] : memref<8x128xf32, #tpu.memory_space<vmem>>, vector<1x128xf32>
    tpu.vector_store %arg11[%187, %c0_67], %186 {strides = array<i32>} : memref<8x128xf32, #tpu.memory_space<vmem>>, vector<1x128xf32>,
    %c5_i32 = arith.constant 5 : i32
    %c8_i32_68 = arith.constant 8 : i32
    %189 = arith.muli %c0_i32_10, %c8_i32_68 : i32
    %190 = arith.addi %189, %c5_i32 : i32
    %191 = arith.index_cast %190 : i32 to index
    %c0_69 = arith.constant 0 : index
    %192 = vector.load %arg10[%191, %c0_69] : memref<8x384xf32, #tpu.memory_space<vmem>>, vector<1x384xf32>
    %c0_70 = arith.constant 0 : index
    %c0_71 = arith.constant 0 : index
    %193 = vector.load %arg5[%c0_70, %c0_71] : memref<128x384xf32, #tpu.memory_space<vmem>>, vector<128x384xf32>
    %cst_72 = arith.constant dense<0.000000e+00> : vector<1x384xf32>
    %194 = tpu.matmul %186, %193, %cst_72 {dimension_numbers = #tpu.dot_dimension_numbers<[1], [0], [0], [1], [0, 0, 1, 1], [], []>} : vector<1x128xf32>, vector<128x384xf32>, vector<1x384xf32> -> vector<1x384xf32>
    %c0_73 = arith.constant 0 : index
    %c0_74 = arith.constant 0 : index
    %195 = vector.load %arg7[%c0_73, %c0_74] : memref<1x384xf32, #tpu.memory_space<vmem>>, vector<1x384xf32>
    %196 = arith.addf %194, %195 : vector<1x384xf32>
    %197 = vector.extract_strided_slice %192 {offsets = [0, 0], sizes = [1, 128], strides = [1, 1]} : vector<1x384xf32> to vector<1x128xf32>
    %198 = vector.extract_strided_slice %196 {offsets = [0, 0], sizes = [1, 128], strides = [1, 1]} : vector<1x384xf32> to vector<1x128xf32>
    %199 = arith.addf %197, %198 : vector<1x128xf32>
    %200 = arith.negf %199 : vector<1x128xf32>
    %201 = math.exp %200 : vector<1x128xf32>
    %cst_75 = arith.constant 1.000000e+00 : f32
    %202 = vector.broadcast %cst_75 : f32 to vector<1x128xf32>
    %203 = arith.addf %202, %201 : vector<1x128xf32>
    %204 = arith.divf %202, %203 : vector<1x128xf32>
    %205 = vector.extract_strided_slice %192 {offsets = [0, 128], sizes = [1, 128], strides = [1, 1]} : vector<1x384xf32> to vector<1x128xf32>
    %206 = vector.extract_strided_slice %196 {offsets = [0, 128], sizes = [1, 128], strides = [1, 1]} : vector<1x384xf32> to vector<1x128xf32>
    %207 = arith.addf %205, %206 : vector<1x128xf32>
    %208 = arith.negf %207 : vector<1x128xf32>
    %209 = math.exp %208 : vector<1x128xf32>
    %cst_76 = arith.constant 1.000000e+00 : f32
    %210 = vector.broadcast %cst_76 : f32 to vector<1x128xf32>
    %211 = arith.addf %210, %209 : vector<1x128xf32>
    %212 = arith.divf %210, %211 : vector<1x128xf32>
    %213 = vector.extract_strided_slice %192 {offsets = [0, 256], sizes = [1, 128], strides = [1, 1]} : vector<1x384xf32> to vector<1x128xf32>
    %214 = vector.extract_strided_slice %196 {offsets = [0, 256], sizes = [1, 128], strides = [1, 1]} : vector<1x384xf32> to vector<1x128xf32>
    %215 = arith.mulf %204, %214 : vector<1x128xf32>
    %216 = arith.addf %213, %215 : vector<1x128xf32>
    %217 = math.tanh %216 : vector<1x128xf32>
    %cst_77 = arith.constant 1.000000e+00 : f32
    %218 = vector.broadcast %cst_77 : f32 to vector<1x128xf32>
    %219 = arith.subf %218, %212 : vector<1x128xf32>
    %220 = arith.mulf %219, %217 : vector<1x128xf32>
    %221 = arith.mulf %212, %186 : vector<1x128xf32>
    %222 = arith.addf %220, %221 : vector<1x128xf32>
    %223 = arith.index_cast %c5_i32 : i32 to index
    %c0_78 = arith.constant 0 : index
    %224 = vector.load %arg11[%223, %c0_78] : memref<8x128xf32, #tpu.memory_space<vmem>>, vector<1x128xf32>
    tpu.vector_store %arg11[%223, %c0_78], %222 {strides = array<i32>} : memref<8x128xf32, #tpu.memory_space<vmem>>, vector<1x128xf32>,
    %c6_i32 = arith.constant 6 : i32
    %c8_i32_79 = arith.constant 8 : i32
    %225 = arith.muli %c0_i32_10, %c8_i32_79 : i32
    %226 = arith.addi %225, %c6_i32 : i32
    %227 = arith.index_cast %226 : i32 to index
    %c0_80 = arith.constant 0 : index
    %228 = vector.load %arg10[%227, %c0_80] : memref<8x384xf32, #tpu.memory_space<vmem>>, vector<1x384xf32>
    %c0_81 = arith.constant 0 : index
    %c0_82 = arith.constant 0 : index
    %229 = vector.load %arg5[%c0_81, %c0_82] : memref<128x384xf32, #tpu.memory_space<vmem>>, vector<128x384xf32>
    %cst_83 = arith.constant dense<0.000000e+00> : vector<1x384xf32>
    %230 = tpu.matmul %222, %229, %cst_83 {dimension_numbers = #tpu.dot_dimension_numbers<[1], [0], [0], [1], [0, 0, 1, 1], [], []>} : vector<1x128xf32>, vector<128x384xf32>, vector<1x384xf32> -> vector<1x384xf32>
    %c0_84 = arith.constant 0 : index
    %c0_85 = arith.constant 0 : index
    %231 = vector.load %arg7[%c0_84, %c0_85] : memref<1x384xf32, #tpu.memory_space<vmem>>, vector<1x384xf32>
    %232 = arith.addf %230, %231 : vector<1x384xf32>
    %233 = vector.extract_strided_slice %228 {offsets = [0, 0], sizes = [1, 128], strides = [1, 1]} : vector<1x384xf32> to vector<1x128xf32>
    %234 = vector.extract_strided_slice %232 {offsets = [0, 0], sizes = [1, 128], strides = [1, 1]} : vector<1x384xf32> to vector<1x128xf32>
    %235 = arith.addf %233, %234 : vector<1x128xf32>
    %236 = arith.negf %235 : vector<1x128xf32>
    %237 = math.exp %236 : vector<1x128xf32>
    %cst_86 = arith.constant 1.000000e+00 : f32
    %238 = vector.broadcast %cst_86 : f32 to vector<1x128xf32>
    %239 = arith.addf %238, %237 : vector<1x128xf32>
    %240 = arith.divf %238, %239 : vector<1x128xf32>
    %241 = vector.extract_strided_slice %228 {offsets = [0, 128], sizes = [1, 128], strides = [1, 1]} : vector<1x384xf32> to vector<1x128xf32>
    %242 = vector.extract_strided_slice %232 {offsets = [0, 128], sizes = [1, 128], strides = [1, 1]} : vector<1x384xf32> to vector<1x128xf32>
    %243 = arith.addf %241, %242 : vector<1x128xf32>
    %244 = arith.negf %243 : vector<1x128xf32>
    %245 = math.exp %244 : vector<1x128xf32>
    %cst_87 = arith.constant 1.000000e+00 : f32
    %246 = vector.broadcast %cst_87 : f32 to vector<1x128xf32>
    %247 = arith.addf %246, %245 : vector<1x128xf32>
    %248 = arith.divf %246, %247 : vector<1x128xf32>
    %249 = vector.extract_strided_slice %228 {offsets = [0, 256], sizes = [1, 128], strides = [1, 1]} : vector<1x384xf32> to vector<1x128xf32>
    %250 = vector.extract_strided_slice %232 {offsets = [0, 256], sizes = [1, 128], strides = [1, 1]} : vector<1x384xf32> to vector<1x128xf32>
    %251 = arith.mulf %240, %250 : vector<1x128xf32>
    %252 = arith.addf %249, %251 : vector<1x128xf32>
    %253 = math.tanh %252 : vector<1x128xf32>
    %cst_88 = arith.constant 1.000000e+00 : f32
    %254 = vector.broadcast %cst_88 : f32 to vector<1x128xf32>
    %255 = arith.subf %254, %248 : vector<1x128xf32>
    %256 = arith.mulf %255, %253 : vector<1x128xf32>
    %257 = arith.mulf %248, %222 : vector<1x128xf32>
    %258 = arith.addf %256, %257 : vector<1x128xf32>
    %259 = arith.index_cast %c6_i32 : i32 to index
    %c0_89 = arith.constant 0 : index
    %260 = vector.load %arg11[%259, %c0_89] : memref<8x128xf32, #tpu.memory_space<vmem>>, vector<1x128xf32>
    tpu.vector_store %arg11[%259, %c0_89], %258 {strides = array<i32>} : memref<8x128xf32, #tpu.memory_space<vmem>>, vector<1x128xf32>,
    %c7_i32 = arith.constant 7 : i32
    %c8_i32_90 = arith.constant 8 : i32
    %261 = arith.muli %c0_i32_10, %c8_i32_90 : i32
    %262 = arith.addi %261, %c7_i32 : i32
    %263 = arith.index_cast %262 : i32 to index
    %c0_91 = arith.constant 0 : index
    %264 = vector.load %arg10[%263, %c0_91] : memref<8x384xf32, #tpu.memory_space<vmem>>, vector<1x384xf32>
    %c0_92 = arith.constant 0 : index
    %c0_93 = arith.constant 0 : index
    %265 = vector.load %arg5[%c0_92, %c0_93] : memref<128x384xf32, #tpu.memory_space<vmem>>, vector<128x384xf32>
    %cst_94 = arith.constant dense<0.000000e+00> : vector<1x384xf32>
    %266 = tpu.matmul %258, %265, %cst_94 {dimension_numbers = #tpu.dot_dimension_numbers<[1], [0], [0], [1], [0, 0, 1, 1], [], []>} : vector<1x128xf32>, vector<128x384xf32>, vector<1x384xf32> -> vector<1x384xf32>
    %c0_95 = arith.constant 0 : index
    %c0_96 = arith.constant 0 : index
    %267 = vector.load %arg7[%c0_95, %c0_96] : memref<1x384xf32, #tpu.memory_space<vmem>>, vector<1x384xf32>
    %268 = arith.addf %266, %267 : vector<1x384xf32>
    %269 = vector.extract_strided_slice %264 {offsets = [0, 0], sizes = [1, 128], strides = [1, 1]} : vector<1x384xf32> to vector<1x128xf32>
    %270 = vector.extract_strided_slice %268 {offsets = [0, 0], sizes = [1, 128], strides = [1, 1]} : vector<1x384xf32> to vector<1x128xf32>
    %271 = arith.addf %269, %270 : vector<1x128xf32>
    %272 = arith.negf %271 : vector<1x128xf32>
    %273 = math.exp %272 : vector<1x128xf32>
    %cst_97 = arith.constant 1.000000e+00 : f32
    %274 = vector.broadcast %cst_97 : f32 to vector<1x128xf32>
    %275 = arith.addf %274, %273 : vector<1x128xf32>
    %276 = arith.divf %274, %275 : vector<1x128xf32>
    %277 = vector.extract_strided_slice %264 {offsets = [0, 128], sizes = [1, 128], strides = [1, 1]} : vector<1x384xf32> to vector<1x128xf32>
    %278 = vector.extract_strided_slice %268 {offsets = [0, 128], sizes = [1, 128], strides = [1, 1]} : vector<1x384xf32> to vector<1x128xf32>
    %279 = arith.addf %277, %278 : vector<1x128xf32>
    %280 = arith.negf %279 : vector<1x128xf32>
    %281 = math.exp %280 : vector<1x128xf32>
    %cst_98 = arith.constant 1.000000e+00 : f32
    %282 = vector.broadcast %cst_98 : f32 to vector<1x128xf32>
    %283 = arith.addf %282, %281 : vector<1x128xf32>
    %284 = arith.divf %282, %283 : vector<1x128xf32>
    %285 = vector.extract_strided_slice %264 {offsets = [0, 256], sizes = [1, 128], strides = [1, 1]} : vector<1x384xf32> to vector<1x128xf32>
    %286 = vector.extract_strided_slice %268 {offsets = [0, 256], sizes = [1, 128], strides = [1, 1]} : vector<1x384xf32> to vector<1x128xf32>
    %287 = arith.mulf %276, %286 : vector<1x128xf32>
    %288 = arith.addf %285, %287 : vector<1x128xf32>
    %289 = math.tanh %288 : vector<1x128xf32>
    %cst_99 = arith.constant 1.000000e+00 : f32
    %290 = vector.broadcast %cst_99 : f32 to vector<1x128xf32>
    %291 = arith.subf %290, %284 : vector<1x128xf32>
    %292 = arith.mulf %291, %289 : vector<1x128xf32>
    %293 = arith.mulf %284, %258 : vector<1x128xf32>
    %294 = arith.addf %292, %293 : vector<1x128xf32>
    %295 = arith.index_cast %c7_i32 : i32 to index
    %c0_100 = arith.constant 0 : index
    %296 = vector.load %arg11[%295, %c0_100] : memref<8x128xf32, #tpu.memory_space<vmem>>, vector<1x128xf32>
    tpu.vector_store %arg11[%295, %c0_100], %294 {strides = array<i32>} : memref<8x128xf32, #tpu.memory_space<vmem>>, vector<1x128xf32>,
    %c8_i32_101 = arith.constant 8 : i32
    %c8_i32_102 = arith.constant 8 : i32
    %297 = arith.muli %c0_i32_10, %c8_i32_102 : i32
    %298 = tpu.assume_multiple %297, 8 : i32
    %c0_103 = arith.constant 0 : index
    %c0_104 = arith.constant 0 : index
    %299 = vector.load %arg11[%c0_103, %c0_104] : memref<8x128xf32, #tpu.memory_space<vmem>>, vector<8x128xf32>
    %300 = arith.index_cast %298 : i32 to index
    %c0_105 = arith.constant 0 : index
    %301 = vector.load %arg8[%300, %c0_105] : memref<8x128xf32, #tpu.memory_space<vmem>>, vector<8x128xf32>
    tpu.vector_store %arg8[%300, %c0_105], %299 {strides = array<i32>} : memref<8x128xf32, #tpu.memory_space<vmem>>, vector<8x128xf32>,
    %c1_i32_106 = arith.constant 1 : i32
    return
  }
  func.func @transform_0(%arg0: i32, %arg1: memref<8xi32, #tpu.memory_space<smem>>) -> (i32, i32) {
    %c0_i32 = arith.constant 0 : i32
    %c0_i32_0 = arith.constant 0 : i32
    %c0_i32_1 = arith.constant 0 : i32
    return %c0_i32, %c0_i32_0 : i32, i32
  }
  func.func @transform_1(%arg0: i32, %arg1: memref<8xi32, #tpu.memory_space<smem>>) -> (i32, i32) {
    %c0_i32 = arith.constant 0 : i32
    %c0_i32_0 = arith.constant 0 : i32
    %c0_i32_1 = arith.constant 0 : i32
    return %c0_i32, %c0_i32_0 : i32, i32
  }
  func.func @transform_2(%arg0: i32, %arg1: memref<8xi32, #tpu.memory_space<smem>>) -> (i32, i32) {
    %c0_i32 = arith.constant 0 : i32
    %c0_i32_0 = arith.constant 0 : i32
    %c0_i32_1 = arith.constant 0 : i32
    return %c0_i32, %c0_i32_0 : i32, i32
  }
  func.func @transform_3(%arg0: i32, %arg1: memref<8xi32, #tpu.memory_space<smem>>) -> (i32, i32) {
    %c0_i32 = arith.constant 0 : i32
    %c0_i32_0 = arith.constant 0 : i32
    %c0_i32_1 = arith.constant 0 : i32
    return %c0_i32, %c0_i32_0 : i32, i32
  }
  func.func @transform_4(%arg0: i32, %arg1: memref<8xi32, #tpu.memory_space<smem>>) -> (i32, i32) {
    %c0_i32 = arith.constant 0 : i32
    %c0_i32_0 = arith.constant 0 : i32
    %c0_i32_1 = arith.constant 0 : i32
    return %c0_i32, %c0_i32_0 : i32, i32
  }
  func.func @transform_5(%arg0: i32, %arg1: memref<8xi32, #tpu.memory_space<smem>>) -> (i32, i32) {
    %c0_i32 = arith.constant 0 : i32
    %c0_i32_0 = arith.constant 0 : i32
    %c0_i32_1 = arith.constant 0 : i32
    return %c0_i32, %c0_i32_0 : i32, i32
  }
  func.func @transform_6(%arg0: i32, %arg1: memref<8xi32, #tpu.memory_space<smem>>) -> (i32, i32) {
    %c0_i32 = arith.constant 0 : i32
    %c0_i32_0 = arith.constant 0 : i32
    %c0_i32_1 = arith.constant 0 : i32
    return %c0_i32, %c0_i32_0 : i32, i32
  }
}

</mosaic_0001>

<bundles_post_ra>
// kernel: tpu_custom_call.1
= control target key start
LH: loop header
LB: loop body
LE: loop exit
PB: predicated region body
PF: predicated region fallthrough
CT: control target
= control target key end

     0   :  { %s2883_s24 = smov [#allocation6]   ;;  %s3800_s0 = inlined_call_operand.hbm [shape: s32[8], index: 0, kind: input, shape index: {}]   ;;  %s3801_s1 = inlined_call_operand.hbm [shape: f32[64,128], index: 1, kind: input, shape index: {}]   ;;  %s3802_s2 = inlined_call_operand.vmem [shape: f32[1,128], index: 2, kind: input, shape index: {}]   ;;  %s3803_s3 = inlined_call_operand.hbm [shape: f32[128,384], index: 3, kind: input, shape index: {}]   ;;  %s3804_s4 = inlined_call_operand.hbm [shape: f32[128,384], index: 4, kind: input, shape index: {}]   ;;  %s3805_s5 = inlined_call_operand.vmem [shape: f32[1,384], index: 5, kind: input, shape index: {}]   ;;  %s3806_s6 = inlined_call_operand.vmem [shape: f32[1,384], index: 6, kind: input, shape index: {}]   ;;  %s3807_s7 = inlined_call_operand.hbm [shape: f32[8,128], index: 7, kind: output, shape index: {}]  }
   0x1   :  { %13 = dma.hbm_to_smem %s3800_s0, 16, %s2883_s24, [#allocation5] }
   0x2   :  { %2871 = dma.done.wait [#allocation5], 16 }
   0x3   :  { %2872 = vsyncadd [#allocation5], 4294967280 }
   0x4   :  { %15 = sfence }
   0x5   :  { %16 = vsyncpa [#allocation8], 0 }
   0x6   :  { %17 = vsyncpa [#allocation11], 0 }
   0x7   :  { %18 = vsyncpa [#allocation9], 0  ;;  %s2884_s27 = smov [#allocation10]  }
   0x8   :  { %s38_s28 = sshll.u32 %s2884_s27, 4  ;;  %s39_s28 = int_to_ptr.vmem [resolvable:$true] %s38_s28 }
   0x9   :  { %s2795_s29 = scalar_lea.vmem %s39_s28, 6144  ;;  %p2800_p1 = scmp.lt.s32.totalorder %s39_s28, %s39_s28 }
   0xa   :  { %p2796_p0 = scmp.ne.s32.totalorder %s39_s28, %s2795_s29  ;;  %p2801_p2 = scmp.lt.s32.totalorder %s2795_s29, %s2795_s29 }
   0xc   :  { %p2802_p3 = por %p2801_p2, %p2800_p1 }
   0xe   :  { %p2803_p4 = pnand %p2802_p3, %p2796_p0 }
  0x10   :  { %2806 = shalt.err (!%p2803_p4)
}
  0x11   :  { %s2885_s30 = smov 384   ;;  %s2886_s8 = smov 24  }
  0x12   :  { %44 = dma.hbm_to_vmem [thread:$0]  %s3803_s3, 6144, %s39_s28, [#allocation11], %s2885_s30, %s2885_s30, %s2886_s8  }
  0x13   :  { %s2887_s10 = smov [#allocation7]  }
  0x14   :  { %s24_s11 = sshll.u32 %s2887_s10, 4  ;;  %s25_s11 = int_to_ptr.vmem [resolvable:$true] %s24_s11 }
  0x15   :  { %s2815_s12 = scalar_lea.vmem %s25_s11, 1024  ;;  %p2820_p6 = scmp.lt.s32.totalorder %s25_s11, %s25_s11 }
  0x16   :  { %p2816_p5 = scmp.ne.s32.totalorder %s25_s11, %s2815_s12  ;;  %p2821_p7 = scmp.lt.s32.totalorder %s2815_s12, %s2815_s12 }
  0x18   :  { %p2822_p8 = por %p2821_p7, %p2820_p6 }
  0x1a   :  { %p2823_p9 = pnand %p2822_p8, %p2816_p5 }
  0x1c   :  { %2826 = shalt.err (!%p2823_p9)
}
  0x1d   :  { %s2888_s13 = smov 128   ;;  %s2889_s14 = smov 8  }
  0x1e   :  { %30 = dma.hbm_to_vmem [thread:$0]  %s3801_s1, 1024, %s25_s11, [#allocation8], %s2888_s13, %s2888_s13, %s2889_s14  }
  0x1f   :  { %s2890_s17 = smov [#allocation12]  }
  0x20   :  { %s50_s18 = sshll.u32 %s2890_s17, 4  ;;  %s51_s18 = int_to_ptr.vmem [resolvable:$true] %s50_s18 }
  0x21   :  { %s2835_s3 = scalar_lea.vmem %s51_s18, 6144  ;;  %p2840_p11 = scmp.lt.s32.totalorder %s51_s18, %s51_s18 }
  0x22   :  { %p2836_p10 = scmp.ne.s32.totalorder %s51_s18, %s2835_s3  ;;  %p2841_p12 = scmp.lt.s32.totalorder %s2835_s3, %s2835_s3 }
  0x24   :  { %p2842_p13 = por %p2841_p12, %p2840_p11 }
  0x26   :  { %p2843_p0 = pnand %p2842_p13, %p2836_p10 }
  0x28   :  { %2846 = shalt.err (!%p2843_p0)
}
  0x29   :  { %56 = dma.hbm_to_vmem [thread:$0]  %s3804_s4, 6144, %s51_s18, [#allocation11], %s2885_s30, %s2885_s30, %s2886_s8  }
  0x2a   :  { %2873 = dma.done.wait [#allocation8], 1024  }
  0x2b   :  { %2874 = vsyncadd [#allocation8], 4294966272 }
  0x2c   :  { %2875 = dma.done.wait [#allocation11], 12288  }
  0x2d   :  { %2876 = vsyncadd [#allocation11], 4294955008  ;;  %s2879_s21 = smov 0  }
  0x2e LB: > { %s76_s1 = sld [smem:[#allocation6 + %s2881_s21]]  ;;  %s79_s23 = scalar_lea.vmem [#allocation2], %s2881_s21  ;;  %s2881_s21 = sphi %s2879_s21, %s75_s21  }
  0x2f   : > { %s75_s21 = sadd.s32 1, %s2881_s21  }
  0x30   : > { %p72_p1 = scmp.ge.s32.totalorder %s75_s21, 8  }
  0x31   :  { %v128_v1 = vld [vmem:[#allocation10 + $0x170] sm:$0xff] (%p72_p1)  ;;  %v127_v2 = vld [vmem:[#allocation10 + $0x168] sm:$0xff] (%p72_p1)  ;;  %v125_v3 = vld [vmem:[#allocation10 + $0x158] sm:$0xff] (%p72_p1)  ;;  %v3808_v4 = vmov (%p72_p1), 0.0   ;;  %vm2892_vm0 = vmmov (%p72_p1), 0  }
  0x32   :  { %74 = sbr.rel (!%p72_p1) target bundleno = 46 (0x2e), region = 72  ;;  %147 = vmatprep.subr.mxu0 (%p72_p1), %v128_v1  ;;  %2365 = vmatprep.subr.mxu1 (%p72_p1), %v3808_v4  ;;  %v124_v5 = vld [vmem:[#allocation10 + $0x150] sm:$0xff] (%p72_p1)  ;;  %v129_v6 = vld [vmem:[#allocation10 + $0x178] sm:$0xff] (%p72_p1)  ;;  %v122_v7 = vld [vmem:[#allocation10 + $0x140] sm:$0xff] (%p72_p1) }
  0x33   :  { %148 = vmatpush1.msra.mxu0 (%p72_p1), %v127_v2  ;;  %2366 = vmatpush3.msra.mxu1 (%p72_p1), %v129_v6  ;;  %v126_v8 = vld [vmem:[#allocation10 + $0x160] sm:$0xff] (%p72_p1)  ;;  %v121_v9 = vld [vmem:[#allocation10 + $0x138] sm:$0xff] (%p72_p1)  ;;  %v123_v10 = vld [vmem:[#allocation10 + $0x148] sm:$0xff] (%p72_p1) }
  0x34   : > { %s77_s22 = scalar_lea.vmem [#allocation7], %s76_s1  ;;  %149 = vmatprep.subr.mxu0 (%p72_p1), %v125_v3  ;;  %2367 = vmatprep.subr.mxu1 (%p72_p1), %v3808_v4  ;;  %v119_v11 = vld [vmem:[#allocation10 + $0x128] sm:$0xff] (%p72_p1)  ;;  %v118_v12 = vld [vmem:[#allocation10 + $0x120] sm:$0xff] (%p72_p1)  ;;  %v120_v13 = vld [vmem:[#allocation10 + $0x130] sm:$0xff] (%p72_p1) }
  0x35   : > { %v78_v0 = vld [vmem:[%s77_s22] sm:$0x1]  ;;  %150 = vmatpush1.msra.mxu0 (%p72_p1), %v124_v5  ;;  %2368 = vmatpush3.msra.mxu1 (%p72_p1), %v126_v8  ;;  %v116_v14 = vld [vmem:[#allocation10 + $0x110] sm:$0xff] (%p72_p1)  ;;  %v115_v15 = vld [vmem:[#allocation10 + $0x108] sm:$0xff] (%p72_p1) }
  0x36   : > { %80 = vst [vmem:[%s79_s23] sm:$0x1] %v78_v0  ;;  %151 = vmatprep.subr.mxu0 (%p72_p1), %v122_v7  ;;  %2369 = vmatprep.subr.mxu1 (%p72_p1), %v3808_v4  ;;  %v117_v16 = vld [vmem:[#allocation10 + $0x118] sm:$0xff] (%p72_p1)  ;;  %v112_v18 = vld [vmem:[#allocation10 + $0xf0] sm:$0xff] (%p72_p1)  ;;  %v114_v19 = vld [vmem:[#allocation10 + $0x100] sm:$0xff] (%p72_p1) }
  0x37   :  { %152 = vmatpush1.msra.mxu0 %v121_v9  ;;  %2370 = vmatpush3.msra.mxu1 %v123_v10  ;;  %v113_v17 = vld [vmem:[#allocation10 + $0xf8] sm:$0xff]  ;;  %v110_v20 = vld [vmem:[#allocation10 + $0xe0] sm:$0xff]  ;;  %v111_v22 = vld [vmem:[#allocation10 + $0xe8] sm:$0xff] }
  0x38   :  { %153 = vmatprep.subr.mxu0 %v119_v11  ;;  %2371 = vmatprep.subr.mxu1 %v3808_v4  ;;  %v109_v21 = vld [vmem:[#allocation10 + $0xd8] sm:$0xff]  ;;  %v107_v23 = vld [vmem:[#allocation10 + $0xc8] sm:$0xff]  ;;  %v106_v24 = vld [vmem:[#allocation10 + $0xc0] sm:$0xff] }
  0x39   :  { %154 = vmatpush1.msra.mxu0 %v118_v12  ;;  %2372 = vmatpush3.msra.mxu1 %v120_v13  ;;  %v108_v25 = vld [vmem:[#allocation10 + $0xd0] sm:$0xff]  ;;  %v103_v27 = vld [vmem:[#allocation10 + $0xa8] sm:$0xff]  ;;  %v105_v28 = vld [vmem:[#allocation10 + $0xb8] sm:$0xff] }
  0x3a   :  { %155 = vmatprep.subr.mxu0 %v116_v14  ;;  %2373 = vmatprep.subr.mxu1 %v3808_v4  ;;  %v104_v26 = vld [vmem:[#allocation10 + $0xb0] sm:$0xff]  ;;  %v101_v29 = vld [vmem:[#allocation10 + $0x98] sm:$0xff]  ;;  %v102_v31 = vld [vmem:[#allocation10 + $0xa0] sm:$0xff] }
  0x3b   :  { %156 = vmatpush1.msra.mxu0 %v115_v15  ;;  %2374 = vmatpush3.msra.mxu1 %v117_v16  ;;  %v100_v30 = vld [vmem:[#allocation10 + $0x90] sm:$0xff]  ;;  %v98_v32 = vld [vmem:[#allocation10 + $0x80] sm:$0xff]  ;;  %v97_v33 = vld [vmem:[#allocation10 + $0x78] sm:$0xff] }
  0x3c   :  { %157 = vmatprep.subr.mxu0 %v113_v17  ;;  %2375 = vmatprep.subr.mxu1 %v3808_v4  ;;  %v99_v34 = vld [vmem:[#allocation10 + $0x88] sm:$0xff]  ;;  %v94_v36 = vld [vmem:[#allocation10 + $0x60] sm:$0xff]  ;;  %v96_v37 = vld [vmem:[#allocation10 + $0x70] sm:$0xff] }
  0x3d   :  { %158 = vmatpush1.msra.mxu0 %v112_v18  ;;  %2376 = vmatpush3.msra.mxu1 %v114_v19  ;;  %v95_v35 = vld [vmem:[#allocation10 + $0x68] sm:$0xff]  ;;  %v92_v38 = vld [vmem:[#allocation10 + $0x50] sm:$0xff]  ;;  %v93_v40 = vld [vmem:[#allocation10 + $0x58] sm:$0xff] }
  0x3e   :  { %159 = vmatprep.subr.mxu0 %v110_v20  ;;  %2377 = vmatprep.subr.mxu1 %v3808_v4  ;;  %v91_v39 = vld [vmem:[#allocation10 + $0x48] sm:$0xff]  ;;  %v89_v41 = vld [vmem:[#allocation10 + $0x38] sm:$0xff]  ;;  %v88_v42 = vld [vmem:[#allocation10 + $0x30] sm:$0xff] }
  0x3f   :  { %160 = vmatpush1.msra.mxu0 %v109_v21  ;;  %2378 = vmatpush3.msra.mxu1 %v111_v22  ;;  %v90_v43 = vld [vmem:[#allocation10 + $0x40] sm:$0xff]  ;;  %v85_v45 = vld [vmem:[#allocation10 + $0x18] sm:$0xff]  ;;  %v83_v46 = vld [vmem:[#allocation10 + $0x8] sm:$0xff] }
  0x40   :  { %161 = vmatprep.subr.mxu0 %v107_v23  ;;  %2379 = vmatprep.subr.mxu1 %v3808_v4  ;;  %v86_v44 = vld [vmem:[#allocation10 + $0x20] sm:$0xff]  ;;  %v87_v47 = vld [vmem:[#allocation10 + $0x28] sm:$0xff]  ;;  %v81_v49 = vld [vmem:[#allocation2] sm:$0xff] }
  0x41   :  { %162 = vmatpush1.msra.mxu0 %v106_v24  ;;  %2380 = vmatpush3.msra.mxu1 %v108_v25  ;;  %v82_v48 = vld [vmem:[#allocation10] sm:$0xff]  ;;  %v2962_v50 = vld [vmem:[#allocation12 + $0x170] sm:$0xff]  ;;  %v2965_v52 = vld [vmem:[#allocation12 + $0x168] sm:$0xff] }
  0x42   :  { %163 = vmatprep.subr.mxu0 %v104_v26  ;;  %2381 = vmatprep.subr.mxu1 %v3808_v4  ;;  %3849 = vst [vmem:[#allocation18_spill] sm:$0xff] %v2962_v50  ;;  %v84_v51 = vld [vmem:[#allocation10 + $0x10] sm:$0xff]  ;;  %v2968_v53 = vld [vmem:[#allocation12 + $0x158] sm:$0xff]  ;;  %v2975_v55 = vld [vmem:[#allocation12 + $0x140] sm:$0xff] }
  0x43   :  { %164 = vmatpush1.msra.mxu0 %v103_v27  ;;  %2382 = vmatpush3.msra.mxu1 %v105_v28  ;;  %v2972_v54 = vld [vmem:[#allocation12 + $0x150] sm:$0xff]  ;;  %v2977_v56 = vld [vmem:[#allocation12 + $0x178] sm:$0xff]  ;;  %v2984_v58 = vld [vmem:[#allocation12 + $0x128] sm:$0xff] }
  0x44   :  { %165 = vmatprep.subr.mxu0 %v101_v29  ;;  %2383 = vmatprep.subr.mxu1 %v3808_v4  ;;  %v2980_v57 = vld [vmem:[#allocation12 + $0x138] sm:$0xff]  ;;  %v2987_v59 = vld [vmem:[#allocation12 + $0x160] sm:$0xff]  ;;  %v2994_v61 = vld [vmem:[#allocation12 + $0x110] sm:$0xff] }
  0x45   :  { %166 = vmatpush1.msra.mxu0 %v100_v30  ;;  %2384 = vmatpush3.msra.mxu1 %v102_v31  ;;  %v2990_v60 = vld [vmem:[#allocation12 + $0x120] sm:$0xff]  ;;  %v2997_v62 = vld [vmem:[#allocation12 + $0x148] sm:$0xff]  ;;  %v3004_v0 = vld [vmem:[#allocation12 + $0xf8] sm:$0xff] }
  0x46   :  { %167 = vmatprep.subr.mxu0 %v98_v32  ;;  %2385 = vmatprep.subr.mxu1 %v3808_v4  ;;  %v3000_v63 = vld [vmem:[#allocation12 + $0x108] sm:$0xff]  ;;  %v3007_v1 = vld [vmem:[#allocation12 + $0x130] sm:$0xff]  ;;  %v3014_v3 = vld [vmem:[#allocation12 + $0xe0] sm:$0xff] }
  0x47   :  { %168 = vmatpush1.msra.mxu0 %v97_v33  ;;  %2386 = vmatpush3.msra.mxu1 %v99_v34  ;;  %v3010_v2 = vld [vmem:[#allocation12 + $0xf0] sm:$0xff]  ;;  %v3017_v5 = vld [vmem:[#allocation12 + $0x118] sm:$0xff]  ;;  %v3024_v7 = vld [vmem:[#allocation12 + $0xc8] sm:$0xff] }
  0x48   :  { %169 = vmatprep.subr.mxu0 %v95_v35  ;;  %2387 = vmatprep.subr.mxu1 %v3808_v4  ;;  %v3020_v6 = vld [vmem:[#allocation12 + $0xd8] sm:$0xff]  ;;  %v3027_v8 = vld [vmem:[#allocation12 + $0x100] sm:$0xff]  ;;  %v3034_v10 = vld [vmem:[#allocation12 + $0xb0] sm:$0xff] }
  0x49   :  { %170 = vmatpush1.msra.mxu0 %v94_v36  ;;  %2388 = vmatpush3.msra.mxu1 %v96_v37  ;;  %v3030_v9 = vld [vmem:[#allocation12 + $0xc0] sm:$0xff]  ;;  %v3037_v11 = vld [vmem:[#allocation12 + $0xe8] sm:$0xff]  ;;  %v3044_v13 = vld [vmem:[#allocation12 + $0x98] sm:$0xff]  ;;  %v132_v37 = vlaneseq }
  0x4a   :  { %171 = vmatprep.subr.mxu0 %v92_v38  ;;  %2389 = vmatprep.subr.mxu1 %v3808_v4  ;;  %v3040_v12 = vld [vmem:[#allocation12 + $0xa8] sm:$0xff]  ;;  %v3047_v14 = vld [vmem:[#allocation12 + $0xd0] sm:$0xff]  ;;  %v3054_v16 = vld [vmem:[#allocation12 + $0x80] sm:$0xff] }
  0x4b   :  { %172 = vmatpush1.msra.mxu0 %v91_v39  ;;  %2390 = vmatpush3.msra.mxu1 %v93_v40  ;;  %v3050_v15 = vld [vmem:[#allocation12 + $0x90] sm:$0xff]  ;;  %v3057_v17 = vld [vmem:[#allocation12 + $0xb8] sm:$0xff]  ;;  %v3064_v19 = vld [vmem:[#allocation12 + $0x68] sm:$0xff]  ;;  %v133_v38 = vshrl.u32 %v132_v37, 7 }
  0x4c   :  { %173 = vmatprep.subr.mxu0 %v89_v41  ;;  %2391 = vmatprep.subr.mxu1 %v3808_v4  ;;  %v3060_v18 = vld [vmem:[#allocation12 + $0x78] sm:$0xff]  ;;  %v3067_v20 = vld [vmem:[#allocation12 + $0xa0] sm:$0xff]  ;;  %v3074_v22 = vld [vmem:[#allocation12 + $0x50] sm:$0xff] }
  0x4d   :  { %174 = vmatpush1.msra.mxu0 %v88_v42  ;;  %2392 = vmatpush3.msra.mxu1 %v90_v43  ;;  %v3070_v21 = vld [vmem:[#allocation12 + $0x60] sm:$0xff]  ;;  %v3077_v23 = vld [vmem:[#allocation12 + $0x88] sm:$0xff]  ;;  %v3084_v25 = vld [vmem:[#allocation12 + $0x38] sm:$0xff]  ;;  %v3204_v39 = vsub.s32 0, %v133_v38  ;;  %v3209_v41 = vsub.s32 1, %v133_v38  ;;  %v3211_v42 = vsub.s32 2, %v133_v38 }
  0x4e   :  { %175 = vmatprep.subr.mxu0 %v86_v44  ;;  %2393 = vmatprep.subr.mxu1 %v3808_v4  ;;  %v3080_v24 = vld [vmem:[#allocation12 + $0x48] sm:$0xff]  ;;  %v3087_v26 = vld [vmem:[#allocation12 + $0x70] sm:$0xff]  ;;  %v3094_v28 = vld [vmem:[#allocation12 + $0x20] sm:$0xff] }
  0x4f   :  { %176 = vmatpush1.msra.mxu0 %v85_v45  ;;  %211 = vmatprep.mubr.f32.mxu0 %v3808_v4  ;;  %v3090_v27 = vld [vmem:[#allocation12 + $0x30] sm:$0xff]  ;;  %3851 = vst [vmem:[#allocation20_spill] sm:$0xff] %v3094_v28  ;;  %v3097_v29 = vld [vmem:[#allocation12 + $0x58] sm:$0xff]  ;;  %v3104_v31 = vld [vmem:[#allocation12 + $0x8] sm:$0xff] }
  0x50   :  { %177 = vmatprep.subr.mxu0 %v83_v46  ;;  %2394 = vmatpush3.msra.mxu1 %v87_v47  ;;  %3850 = vst [vmem:[#allocation19_spill] sm:$0xff] %v3090_v27  ;;  %v3100_v30 = vld [vmem:[#allocation12 + $0x18] sm:$0xff]  ;;  %3853 = vst [vmem:[#allocation22_spill] sm:$0xff] %v3104_v31  ;;  %v3107_v32 = vld [vmem:[#allocation12 + $0x40] sm:$0xff] }
  0x51   :  { %178 = vmatpush1.msra.mxu0 %v82_v48  ;;  %2395 = vmatprep.subr.mxu1 %v3808_v4  ;;  %3852 = vst [vmem:[#allocation21_spill] sm:$0xff] %v3100_v30  ;;  %3854 = vst [vmem:[#allocation23_spill] sm:$0xff] %v3107_v32  ;;  %v3110_v33 = vld [vmem:[#allocation12] sm:$0xff]  ;;  %v3117_v34 = vld [vmem:[%s3802_s2] sm:$0x1] }
  0x52   :  { %212 = vmatmul.mubr.f32.vlgmr.msra.gmra.mxu0 %v81_v49  ;;  %358 = vmatprep.subr.mxu0 %v2962_v50  ;;  %3855 = vst [vmem:[#allocation24_spill] sm:$0xff] %v3110_v33  ;;  %v3120_v35 = vld [vmem:[#allocation12 + $0x28] sm:$0xff]  ;;  %v3126_v36 = vld [vmem:[#allocation12 + $0x10] sm:$0xff]  ;;  %3858 = vst [vmem:[#allocation27_spill] sm:$0xff] %v3204_v39 }
  0x53   :  { %2396 = vmatpush3.msra.mxu1 %v84_v51  ;;  %2397 = vmatprep.mubr.msk.f32.mxu1 %vm2892_vm0, %v3808_v4  ;;  %3856 = vst [vmem:[#allocation25_spill] sm:$0xff] %v3120_v35  ;;  %3857 = vst [vmem:[#allocation26_spill] sm:$0xff] %v3126_v36  ;;  %v130_v40 = vld [vmem:[%s3805_s5] sm:$0x7] }
  0x54   :  { %359 = vmatpush1.msra.mxu0 %v2965_v52  ;;  %2398 = vmatmul.mubr.f32.vlgmr.msra.gmra.mxu1 %v81_v49  ;;  %3859 = vst [vmem:[#allocation28_spill] sm:$0xff] %v3209_v41  ;;  %v135_v43 = vrot.slane %v130_v40, %v3204_v39  ;;  %v139_v44 = vrot.slane %v130_v40, %v3209_v41  ;;  %v341_v38 = vld [vmem:[%s3806_s6] sm:$0x7] }
  0x55   :  { %360 = vmatprep.subr.mxu0 %v2968_v53  ;;  %422 = vmatprep.mubr.f32.mxu0 %v3808_v4  ;;  %v143_v45 = vrot.slane %v130_v40, %v3211_v42  ;;  %v350_v40 = vrot.slane %v341_v38, %v3209_v41 }
  0x56   :  { %361 = vmatpush1.msra.mxu0 %v2972_v54  ;;  %2400 = vmatprep.subr.mxu1 %v3808_v4 }
  0x57   :  { %362 = vmatprep.subr.mxu0 %v2975_v55  ;;  %2401 = vmatpush3.msra.mxu1 %v2977_v56 }
  0x58   :  { %363 = vmatpush1.msra.mxu0 %v2980_v57  ;;  %2402 = vmatprep.subr.mxu1 %v3808_v4 }
  0x59   :  { %364 = vmatprep.subr.mxu0 %v2984_v58  ;;  %2403 = vmatpush3.msra.mxu1 %v2987_v59 }
  0x5a   :  { %365 = vmatpush1.msra.mxu0 %v2990_v60  ;;  %2404 = vmatprep.subr.mxu1 %v3808_v4 }
  0x5b   :  { %366 = vmatprep.subr.mxu0 %v2994_v61  ;;  %2405 = vmatpush3.msra.mxu1 %v2997_v62 }
  0x5c   :  { %367 = vmatpush1.msra.mxu0 %v3000_v63  ;;  %2406 = vmatprep.subr.mxu1 %v3808_v4 }
  0x5d   :  { %368 = vmatprep.subr.mxu0 %v3004_v0  ;;  %2407 = vmatpush3.msra.mxu1 %v3007_v1 }
  0x5e   :  { %369 = vmatpush1.msra.mxu0 %v3010_v2  ;;  %2408 = vmatprep.subr.mxu1 %v3808_v4 }
  0x5f   :  { %370 = vmatprep.subr.mxu0 %v3014_v3  ;;  %2409 = vmatpush3.msra.mxu1 %v3017_v5 }
  0x60   :  { %371 = vmatpush1.msra.mxu0 %v3020_v6  ;;  %2410 = vmatprep.subr.mxu1 %v3808_v4 }
  0x61   :  { %372 = vmatprep.subr.mxu0 %v3024_v7  ;;  %2411 = vmatpush3.msra.mxu1 %v3027_v8 }
  0x62   :  { %373 = vmatpush1.msra.mxu0 %v3030_v9  ;;  %2412 = vmatprep.subr.mxu1 %v3808_v4 }
  0x63   :  { %374 = vmatprep.subr.mxu0 %v3034_v10  ;;  %2413 = vmatpush3.msra.mxu1 %v3037_v11 }
  0x64   :  { %375 = vmatpush1.msra.mxu0 %v3040_v12  ;;  %2414 = vmatprep.subr.mxu1 %v3808_v4 }
  0x65   :  { %376 = vmatprep.subr.mxu0 %v3044_v13  ;;  %2415 = vmatpush3.msra.mxu1 %v3047_v14 }
  0x66   :  { %377 = vmatpush1.msra.mxu0 %v3050_v15  ;;  %2416 = vmatprep.subr.mxu1 %v3808_v4 }
  0x67   :  { %378 = vmatprep.subr.mxu0 %v3054_v16  ;;  %2417 = vmatpush3.msra.mxu1 %v3057_v17 }
  0x68   :  { %379 = vmatpush1.msra.mxu0 %v3060_v18  ;;  %2418 = vmatprep.subr.mxu1 %v3808_v4 }
  0x69   :  { %380 = vmatprep.subr.mxu0 %v3064_v19  ;;  %2419 = vmatpush3.msra.mxu1 %v3067_v20 }
  0x6a   :  { %381 = vmatpush1.msra.mxu0 %v3070_v21  ;;  %2420 = vmatprep.subr.mxu1 %v3808_v4 }
  0x6b   :  { %382 = vmatprep.subr.mxu0 %v3074_v22  ;;  %2421 = vmatpush3.msra.mxu1 %v3077_v23 }
  0x6c   :  { %383 = vmatpush1.msra.mxu0 %v3080_v24  ;;  %2422 = vmatprep.subr.mxu1 %v3808_v4 }
  0x6d   :  { %384 = vmatprep.subr.mxu0 %v3084_v25  ;;  %2423 = vmatpush3.msra.mxu1 %v3087_v26 }
  0x6e   :  { %385 = vmatpush1.msra.mxu0 %v3090_v27  ;;  %2424 = vmatprep.subr.mxu1 %v3808_v4 }
  0x6f   :  { %386 = vmatprep.subr.mxu0 %v3094_v28  ;;  %2425 = vmatpush3.msra.mxu1 %v3097_v29 }
  0x70   :  { %387 = vmatpush1.msra.mxu0 %v3100_v30  ;;  %2426 = vmatprep.subr.mxu1 %v3808_v4 }
  0x71   :  { %388 = vmatprep.subr.mxu0 %v3104_v31  ;;  %2427 = vmatpush3.msra.mxu1 %v3107_v32 }
  0x72   :  { %389 = vmatpush1.msra.mxu0 %v3110_v33  ;;  %2428 = vmatprep.subr.mxu1 %v3808_v4 }
  0x73   :  { %423 = vmatmul.mubr.f32.vlgmr.msra.gmra.mxu0 %v3117_v34  ;;  %2429 = vmatpush3.msra.mxu1 %v3120_v35 }
  0x74   :  { %2430 = vmatprep.subr.mxu1 %v3808_v4  ;;  %2432 = vmatprep.mubr.msk.f32.mxu1 %vm2892_vm0, %v3808_v4 }
  0x75   :  { %2431 = vmatpush3.msra.mxu1 %v3126_v36  ;;  %593 = vmatprep.subr.mxu0 %v2962_v50 }
  0x76   :  { %2433 = vmatmul.mubr.f32.vlgmr.msra.gmra.mxu1 %v3117_v34  ;;  %2435 = vmatprep.subr.mxu1 %v3808_v4 }
  0x77   :  { %594 = vmatpush1.msra.mxu0 %v2965_v52  ;;  %2436 = vmatpush3.msra.mxu1 %v2977_v56 }
  0x78   :  { %595 = vmatprep.subr.mxu0 %v2968_v53  ;;  %2437 = vmatprep.subr.mxu1 %v3808_v4 }
  0x79   :  { %596 = vmatpush1.msra.mxu0 %v2972_v54  ;;  %2438 = vmatpush3.msra.mxu1 %v2987_v59 }
  0x7a   :  { %597 = vmatprep.subr.mxu0 %v2975_v55  ;;  %2439 = vmatprep.subr.mxu1 %v3808_v4 }
  0x7b   :  { %598 = vmatpush1.msra.mxu0 %v2980_v57  ;;  %2440 = vmatpush3.msra.mxu1 %v2997_v62 }
  0x7c   :  { %599 = vmatprep.subr.mxu0 %v2984_v58  ;;  %2441 = vmatprep.subr.mxu1 %v3808_v4 }
  0x7d   :  { %600 = vmatpush1.msra.mxu0 %v2990_v60  ;;  %2442 = vmatpush3.msra.mxu1 %v3007_v1 }
  0x7e   :  { %601 = vmatprep.subr.mxu0 %v2994_v61  ;;  %2443 = vmatprep.subr.mxu1 %v3808_v4 }
  0x7f   :  { %602 = vmatpush1.msra.mxu0 %v3000_v63  ;;  %2444 = vmatpush3.msra.mxu1 %v3017_v5 }
  0x80   :  { %603 = vmatprep.subr.mxu0 %v3004_v0  ;;  %2445 = vmatprep.subr.mxu1 %v3808_v4 }
  0x81   :  { %604 = vmatpush1.msra.mxu0 %v3010_v2  ;;  %2446 = vmatpush3.msra.mxu1 %v3027_v8 }
  0x82   :  { %605 = vmatprep.subr.mxu0 %v3014_v3  ;;  %2447 = vmatprep.subr.mxu1 %v3808_v4 }
  0x83   :  { %606 = vmatpush1.msra.mxu0 %v3020_v6  ;;  %2448 = vmatpush3.msra.mxu1 %v3037_v11 }
  0x84   :  { %607 = vmatprep.subr.mxu0 %v3024_v7  ;;  %2449 = vmatprep.subr.mxu1 %v3808_v4 }
  0x85   :  { %608 = vmatpush1.msra.mxu0 %v3030_v9  ;;  %2450 = vmatpush3.msra.mxu1 %v3047_v14 }
  0x86   :  { %609 = vmatprep.subr.mxu0 %v3034_v10  ;;  %2451 = vmatprep.subr.mxu1 %v3808_v4 }
  0x87   :  { %610 = vmatpush1.msra.mxu0 %v3040_v12  ;;  %2452 = vmatpush3.msra.mxu1 %v3057_v17 }
  0x88   :  { %611 = vmatprep.subr.mxu0 %v3044_v13  ;;  %2453 = vmatprep.subr.mxu1 %v3808_v4 }
  0x89   :  { %612 = vmatpush1.msra.mxu0 %v3050_v15  ;;  %2454 = vmatpush3.msra.mxu1 %v3067_v20 }
  0x8a   :  { %613 = vmatprep.subr.mxu0 %v3054_v16  ;;  %2455 = vmatprep.subr.mxu1 %v3808_v4 }
  0x8b   :  { %614 = vmatpush1.msra.mxu0 %v3060_v18  ;;  %2456 = vmatpush3.msra.mxu1 %v3077_v23 }
  0x8c   :  { %615 = vmatprep.subr.mxu0 %v3064_v19  ;;  %2457 = vmatprep.subr.mxu1 %v3808_v4 }
  0x8d   :  { %616 = vmatpush1.msra.mxu0 %v3070_v21  ;;  %2458 = vmatpush3.msra.mxu1 %v3087_v26 }
  0x8e   :  { %617 = vmatprep.subr.mxu0 %v3074_v22  ;;  %2459 = vmatprep.subr.mxu1 %v3808_v4 }
  0x8f   :  { %618 = vmatpush1.msra.mxu0 %v3080_v24  ;;  %2460 = vmatpush3.msra.mxu1 %v3097_v29 }
  0x90   :  { %619 = vmatprep.subr.mxu0 %v3084_v25  ;;  %2461 = vmatprep.subr.mxu1 %v3808_v4 }
  0x91   :  { %620 = vmatpush1.msra.mxu0 %v3090_v27  ;;  %2462 = vmatpush3.msra.mxu1 %v3107_v32 }
  0x92   :  { %621 = vmatprep.subr.mxu0 %v3094_v28  ;;  %2463 = vmatprep.subr.mxu1 %v3808_v4 }
  0x93   :  { %622 = vmatpush1.msra.mxu0 %v3100_v30  ;;  %2464 = vmatpush3.msra.mxu1 %v3120_v35 }
  0x94   :  { %623 = vmatprep.subr.mxu0 %v3104_v31  ;;  %2465 = vmatprep.subr.mxu1 %v3808_v4 }
  0x95   :  { %624 = vmatpush1.msra.mxu0 %v3110_v33  ;;  %657 = vmatprep.mubr.f32.mxu0 %v3808_v4 }
  0x96   :  { %2466 = vmatpush3.msra.mxu1 %v3126_v36  ;;  %2467 = vmatprep.mubr.msk.f32.mxu1 %vm2892_vm0, %v3808_v4 }
  0x97   :  { %828 = vmatprep.subr.mxu0 %v2962_v50  ;;  %2470 = vmatprep.subr.mxu1 %v3808_v4  ;;  %v346_v50 = vrot.slane %v341_v38, %v3204_v39  ;;  %v354_v39 = vrot.slane %v341_v38, %v3211_v42  ;;  %v3867_v38 = vld [vmem:[#allocation18_spill] sm:$0xff] }
 0x112   :  { %v213_v46 = vpop.f32.mrf.mxu0 }
 0x113   :  { %v214_v47 = vadd.f32 %v213_v46, %v135_v43 }
 0x114   :  { %v215_v48 = vpop.f32.mrf.mxu0  ;;  %v284_v49 = vpop.f32.mrf.mxu1 }
 0x115   :  { %288 = vst [vmem:[#allocation3] sm:$0xff] %v214_v47  ;;  %v216_v51 = vadd.f32 %v215_v48, %v139_v44  ;;  %v285_v37 = vadd.f32 %v284_v49, %v143_v45 }
 0x116   :  { %v2399_v4 = vpop.f32.mrf.mxu1 }
 0x117   :  { %289 = vst [vmem:[#allocation3 + $0x8] sm:$0xff] %v216_v51  ;;  %290 = vst [vmem:[#allocation3 + $0x10] sm:$0xff] %v285_v37 }
 0x11e   :  { %v292_v31 = vld [vmem:[#allocation3] ss:$8 sm:$0x7] }
 0x11f   :  { %v507_v4 = vrot.slane %v292_v31, 1  ;;  %v517_v28 = vrot.slane %v292_v31, 2 }
 0x133   :  { %v424_v36 = vpop.f32.mrf.mxu0 }
 0x134   :  { %v425_v33 = vadd.f32 %v424_v36, %v346_v50 }
 0x135   :  { %v426_v43 = vpop.f32.mrf.mxu0 }
 0x136   :  { %v499_v46 = vadd.f32 %v425_v33, %v292_v31  ;;  %v495_v35 = vpop.f32.mrf.mxu1  ;;  %v427_v44 = vadd.f32 %v426_v43, %v350_v40  ;;  %v3862_v31 = vld [vmem:[#allocation21_spill] sm:$0xff] }
 0x137   :  { %v496_v41 = vadd.f32 %v495_v35, %v354_v39  ;;  %v3864_v35 = vld [vmem:[#allocation22_spill] sm:$0xff]  ;;  %v3865_v39 = vld [vmem:[#allocation24_spill] sm:$0xff] }
 0x138   :  { %v2196_v47 = vmul.f32 -1.442695, %v499_v46  ;;  %v2434_v45 = vpop.f32.mrf.mxu1  ;;  %v509_v48 = vadd.f32 %v507_v4, %v427_v44 }
 0x13a   :  { %2699 = vpow2.f32 %v2196_v47  ;;  %v2197_v49 = vmul.f32 -1.442695, %v509_v48  ;;  %v576_v48 = vld [vmem:[%s3806_s6] sm:$0x7] }
 0x13c   :  { %2701 = vpow2.f32 %v2197_v49  ;;  %v3868_v49 = vld [vmem:[#allocation27_spill] sm:$0xff] }
 0x147   :  { %v2700_v51 = vpop.eup %2699 }
 0x148   :  { %v503_v37 = vadd.f32 1.0, %v2700_v51  ;;  %v581_v51 = vrot.slane %v576_v48, %v3868_v49 }
 0x149   :  { %v2702_v50 = vpop.eup %2701 }
 0x14a   :  { %2703 = vrcp.f32 %v503_v37  ;;  %v513_v36 = vadd.f32 1.0, %v2702_v50 }
 0x14c   :  { %2705 = vrcp.f32 %v513_v36 }
 0x157   :  { %v2704_v30 = vpop.eup %2703 }
 0x158   :  { %v516_v33 = vmul.f32 %v2704_v30, %v496_v41  ;;  %v3861_v30 = vld [vmem:[#allocation20_spill] sm:$0xff]  ;;  %v3866_v41 = vld [vmem:[#allocation26_spill] sm:$0xff] }
 0x159   :  { %v2706_v40 = vpop.eup %2705 }
 0x15a   :  { %v519_v46 = vadd.f32 %v517_v28, %v516_v33  ;;  %v521_v43 = vsub.f32 1.0, %v2706_v40  ;;  %v523_v45 = vmul.f32 %v2706_v40, %v3117_v34  ;;  %v3860_v28 = vmov 0.0   ;;  %v3863_v34 = vld [vmem:[#allocation25_spill] sm:$0xff]  ;;  %v3869_v33 = vld [vmem:[#allocation28_spill] sm:$0xff] }
 0x15b   :  { %v527_v40 = vld [vmem:[#allocation3 + $0x1] ss:$8 sm:$0x7] }
 0x15c   :  { %2707 = vtanh.f32 %v519_v46  ;;  %v585_v46 = vrot.slane %v576_v48, %v3869_v33 }
 0x169   :  { %v2708_v47 = vpop.eup %2707 }
 0x16a   :  { %v522_v44 = vmul.f32 %v2708_v47, %v521_v43 }
 0x16c   :  { %v3223_v4 = vadd.f32 %v523_v45, %v522_v44 }
 0x16e   :  { %525 = vst [vmem:[#allocation4] sm:$0x1] %v3223_v4  ;;  %658 = vmatmul.mubr.f32.vlgmr.msra.gmra.mxu0 %v3223_v4  ;;  %2468 = vmatmul.mubr.f32.vlgmr.msra.gmra.mxu1 %v3223_v4 }
 0x16f   :  { %829 = vmatpush1.msra.mxu0 %v2965_v52  ;;  %2471 = vmatpush3.msra.mxu1 %v2977_v56 }
 0x170   :  { %830 = vmatprep.subr.mxu0 %v2968_v53  ;;  %2472 = vmatprep.subr.mxu1 %v3860_v28 }
 0x171   :  { %831 = vmatpush1.msra.mxu0 %v2972_v54  ;;  %2473 = vmatpush3.msra.mxu1 %v2987_v59 }
 0x172   :  { %832 = vmatprep.subr.mxu0 %v2975_v55  ;;  %2474 = vmatprep.subr.mxu1 %v3860_v28 }
 0x173   :  { %833 = vmatpush1.msra.mxu0 %v2980_v57  ;;  %2475 = vmatpush3.msra.mxu1 %v2997_v62 }
 0x174   :  { %834 = vmatprep.subr.mxu0 %v2984_v58  ;;  %2476 = vmatprep.subr.mxu1 %v3860_v28 }
 0x175   :  { %835 = vmatpush1.msra.mxu0 %v2990_v60  ;;  %2477 = vmatpush3.msra.mxu1 %v3007_v1 }
 0x176   :  { %836 = vmatprep.subr.mxu0 %v2994_v61  ;;  %2478 = vmatprep.subr.mxu1 %v3860_v28 }
 0x177   :  { %837 = vmatpush1.msra.mxu0 %v3000_v63  ;;  %2479 = vmatpush3.msra.mxu1 %v3017_v5 }
 0x178   :  { %838 = vmatprep.subr.mxu0 %v3004_v0  ;;  %2480 = vmatprep.subr.mxu1 %v3860_v28 }
 0x179   :  { %839 = vmatpush1.msra.mxu0 %v3010_v2  ;;  %2481 = vmatpush3.msra.mxu1 %v3027_v8 }
 0x17a   :  { %840 = vmatprep.subr.mxu0 %v3014_v3  ;;  %2482 = vmatprep.subr.mxu1 %v3860_v28 }
 0x17b   :  { %841 = vmatpush1.msra.mxu0 %v3020_v6  ;;  %2483 = vmatpush3.msra.mxu1 %v3037_v11 }
 0x17c   :  { %842 = vmatprep.subr.mxu0 %v3024_v7  ;;  %2484 = vmatprep.subr.mxu1 %v3860_v28 }
 0x17d   :  { %843 = vmatpush1.msra.mxu0 %v3030_v9  ;;  %2485 = vmatpush3.msra.mxu1 %v3047_v14 }
 0x17e   :  { %844 = vmatprep.subr.mxu0 %v3034_v10  ;;  %2486 = vmatprep.subr.mxu1 %v3860_v28 }
 0x17f   :  { %845 = vmatpush1.msra.mxu0 %v3040_v12  ;;  %2487 = vmatpush3.msra.mxu1 %v3057_v17 }
 0x180   :  { %846 = vmatprep.subr.mxu0 %v3044_v13  ;;  %2488 = vmatprep.subr.mxu1 %v3860_v28 }
 0x181   :  { %847 = vmatpush1.msra.mxu0 %v3050_v15  ;;  %2489 = vmatpush3.msra.mxu1 %v3067_v20 }
 0x182   :  { %848 = vmatprep.subr.mxu0 %v3054_v16  ;;  %2490 = vmatprep.subr.mxu1 %v3860_v28 }
 0x183   :  { %849 = vmatpush1.msra.mxu0 %v3060_v18  ;;  %2491 = vmatpush3.msra.mxu1 %v3077_v23 }
 0x184   :  { %850 = vmatprep.subr.mxu0 %v3064_v19  ;;  %2492 = vmatprep.subr.mxu1 %v3860_v28 }
 0x185   :  { %851 = vmatpush1.msra.mxu0 %v3070_v21  ;;  %2493 = vmatpush3.msra.mxu1 %v3087_v26 }
 0x186   :  { %852 = vmatprep.subr.mxu0 %v3074_v22  ;;  %2494 = vmatprep.subr.mxu1 %v3860_v28 }
 0x187   :  { %853 = vmatpush1.msra.mxu0 %v3080_v24  ;;  %2495 = vmatpush3.msra.mxu1 %v3097_v29 }
 0x188   :  { %854 = vmatprep.subr.mxu0 %v3084_v25  ;;  %2496 = vmatprep.subr.mxu1 %v3860_v28 }
 0x189   :  { %855 = vmatpush1.msra.mxu0 %v3090_v27  ;;  %2497 = vmatpush3.msra.mxu1 %v3107_v32  ;;  %v752_v27 = vrot.slane %v527_v40, 2 }
 0x18a   :  { %856 = vmatprep.subr.mxu0 %v3861_v30  ;;  %2498 = vmatprep.subr.mxu1 %v3860_v28  ;;  %v589_v30 = vrot.slane %v576_v48, %v3211_v42  ;;  %v3401_v48 = vld [vmem:[#allocation12 + $0x150] sm:$0xff] }
 0x18b   :  { %857 = vmatpush1.msra.mxu0 %v3862_v31  ;;  %2499 = vmatpush3.msra.mxu1 %v3863_v34 }
 0x18c   :  { %858 = vmatprep.subr.mxu0 %v3864_v35  ;;  %2500 = vmatprep.subr.mxu1 %v3860_v28 }
 0x18d   :  { %859 = vmatpush1.msra.mxu0 %v3865_v39  ;;  %892 = vmatprep.mubr.f32.mxu0 %v3860_v28 }
 0x18e   :  { %2501 = vmatpush3.msra.mxu1 %v3866_v41  ;;  %2502 = vmatprep.mubr.msk.f32.mxu1 %vm2892_vm0, %v3860_v28 }
 0x18f   :  { %1063 = vmatprep.subr.mxu0 %v3867_v38  ;;  %2505 = vmatprep.subr.mxu1 %v3860_v28  ;;  %v742_v38 = vrot.slane %v527_v40, 1 }
 0x22e   :  { %v659_v37 = vpop.f32.mrf.mxu0  ;;  %v730_v50 = vpop.f32.mrf.mxu1 }
 0x22f   :  { %v660_v36 = vadd.f32 %v659_v37, %v581_v51  ;;  %v731_v37 = vadd.f32 %v730_v50, %v589_v30  ;;  %v3391_v30 = vld [vmem:[#allocation12 + $0x168] sm:$0xff]  ;;  %v3407_v50 = vld [vmem:[#allocation12 + $0x140] sm:$0xff] }
 0x230   :  { %v661_v43 = vpop.f32.mrf.mxu0  ;;  %v2469_v47 = vpop.f32.mrf.mxu1 }
 0x231   :  { %v734_v44 = vadd.f32 %v660_v36, %v527_v40  ;;  %v662_v41 = vadd.f32 %v661_v43, %v585_v46  ;;  %v3413_v40 = vld [vmem:[#allocation12 + $0x148] sm:$0xff] }
 0x233   :  { %v2198_v45 = vmul.f32 -1.442695, %v734_v44  ;;  %v744_v39 = vadd.f32 %v742_v38, %v662_v41  ;;  %v3417_v44 = vld [vmem:[#allocation12 + $0x128] sm:$0xff]  ;;  %v3423_v38 = vld [vmem:[#allocation12 + $0x130] sm:$0xff] }
 0x235   :  { %2709 = vpow2.f32 %v2198_v45  ;;  %v2199_v35 = vmul.f32 -1.442695, %v744_v39  ;;  %v3421_v45 = vld [vmem:[#allocation12 + $0x120] sm:$0xff] }
 0x237   :  { %2711 = vpow2.f32 %v2199_v35 }
 0x242   :  { %v2710_v34 = vpop.eup %2709 }
 0x243   :  { %v738_v31 = vadd.f32 1.0, %v2710_v34  ;;  %v3397_v34 = vld [vmem:[#allocation12 + $0x158] sm:$0xff] }
 0x244   :  { %v2712_v49 = vpop.eup %2711 }
 0x245   :  { %2713 = vrcp.f32 %v738_v31  ;;  %v748_v51 = vadd.f32 1.0, %v2712_v49  ;;  %v3393_v31 = vld [vmem:[#allocation12 + $0x178] sm:$0xff]  ;;  %v3403_v49 = vld [vmem:[#allocation12 + $0x160] sm:$0xff] }
 0x247   :  { %2715 = vrcp.f32 %v748_v51  ;;  %v3427_v51 = vld [vmem:[#allocation12 + $0x110] sm:$0xff] }
 0x252   :  { %v2714_v33 = vpop.eup %2713 }
 0x253   :  { %v751_v32 = vmul.f32 %v2714_v33, %v731_v37  ;;  %v3411_v33 = vld [vmem:[#allocation12 + $0x138] sm:$0xff]  ;;  %v3431_v37 = vld [vmem:[#allocation12 + $0x108] sm:$0xff] }
 0x254   :  { %v2716_v46 = vpop.eup %2715 }
 0x255   :  { %v754_v36 = vadd.f32 %v752_v27, %v751_v32  ;;  %v756_v43 = vsub.f32 1.0, %v2716_v46  ;;  %v758_v35 = vmul.f32 %v2716_v46, %v3223_v4  ;;  %v3388_v4 = vld [vmem:[#allocation12 + $0x170] sm:$0xff]  ;;  %v3437_v46 = vld [vmem:[#allocation12 + $0xf8] sm:$0xff] }
 0x256   :  { %3880 = vst [vmem:[#allocation18_spill] sm:$0xff] %v3388_v4 }
 0x257   :  { %2717 = vtanh.f32 %v754_v36  ;;  %v3433_v36 = vld [vmem:[#allocation12 + $0x118] sm:$0xff] }
 0x264   :  { %v2718_v47 = vpop.eup %2717 }
 0x265   :  { %v757_v41 = vmul.f32 %v2718_v47, %v756_v43  ;;  %v3441_v43 = vld [vmem:[#allocation12 + $0xf0] sm:$0xff]  ;;  %v3443_v47 = vld [vmem:[#allocation12 + $0x100] sm:$0xff] }
 0x267   :  { %v3302_v39 = vadd.f32 %v758_v35, %v757_v41  ;;  %v3447_v41 = vld [vmem:[#allocation12 + $0xe0] sm:$0xff]  ;;  %v3451_v35 = vld [vmem:[#allocation12 + $0xd8] sm:$0xff] }
 0x269   :  { %760 = vst [vmem:[#allocation4 + $0x1] sm:$0x1] %v3302_v39  ;;  %893 = vmatmul.mubr.f32.vlgmr.msra.gmra.mxu0 %v3302_v39  ;;  %2503 = vmatmul.mubr.f32.vlgmr.msra.gmra.mxu1 %v3302_v39 }
 0x26a   :  { %1064 = vmatpush1.msra.mxu0 %v2965_v52  ;;  %2506 = vmatpush3.msra.mxu1 %v2977_v56  ;;  %v3870_v52 = vld [vmem:[#allocation19_spill] sm:$0xff]  ;;  %v3874_v56 = vld [vmem:[#allocation25_spill] sm:$0xff] }
 0x26b   :  { %1065 = vmatprep.subr.mxu0 %v2968_v53  ;;  %2507 = vmatprep.subr.mxu1 %v3860_v28  ;;  %v3871_v53 = vld [vmem:[#allocation23_spill] sm:$0xff] }
 0x26c   :  { %1066 = vmatpush1.msra.mxu0 %v2972_v54  ;;  %2508 = vmatpush3.msra.mxu1 %v2987_v59  ;;  %v3872_v54 = vld [vmem:[#allocation20_spill] sm:$0xff]  ;;  %v3877_v59 = vld [vmem:[#allocation26_spill] sm:$0xff] }
 0x26d   :  { %1067 = vmatprep.subr.mxu0 %v2975_v55  ;;  %2509 = vmatprep.subr.mxu1 %v3860_v28  ;;  %v3873_v55 = vld [vmem:[#allocation21_spill] sm:$0xff] }
 0x26e   :  { %1068 = vmatpush1.msra.mxu0 %v2980_v57  ;;  %2510 = vmatpush3.msra.mxu1 %v2997_v62  ;;  %v3875_v57 = vld [vmem:[#allocation22_spill] sm:$0xff] }
 0x26f   :  { %1069 = vmatprep.subr.mxu0 %v2984_v58  ;;  %2511 = vmatprep.subr.mxu1 %v3860_v28  ;;  %v3876_v58 = vld [vmem:[#allocation24_spill] sm:$0xff] }
 0x270   :  { %1070 = vmatpush1.msra.mxu0 %v2990_v60  ;;  %2512 = vmatpush3.msra.mxu1 %v3007_v1  ;;  %v811_v60 = vld [vmem:[%s3806_s6] sm:$0x7] }
 0x271   :  { %1071 = vmatprep.subr.mxu0 %v2994_v61  ;;  %2513 = vmatprep.subr.mxu1 %v3860_v28  ;;  %v3878_v61 = vld [vmem:[#allocation27_spill] sm:$0xff] }
 0x272   :  { %1072 = vmatpush1.msra.mxu0 %v3000_v63  ;;  %2514 = vmatpush3.msra.mxu1 %v3017_v5  ;;  %v816_v62 = vrot.slane %v811_v60, %v3878_v61  ;;  %v762_v5 = vld [vmem:[#allocation3 + $0x2] ss:$8 sm:$0x7] }
 0x273   :  { %1073 = vmatprep.subr.mxu0 %v3004_v0  ;;  %2515 = vmatprep.subr.mxu1 %v3860_v28 }
 0x274   :  { %1074 = vmatpush1.msra.mxu0 %v3010_v2  ;;  %2516 = vmatpush3.msra.mxu1 %v3027_v8  ;;  %v3879_v2 = vld [vmem:[#allocation28_spill] sm:$0xff] }
 0x275   :  { %1075 = vmatprep.subr.mxu0 %v3014_v3  ;;  %2517 = vmatprep.subr.mxu1 %v3860_v28  ;;  %v820_v3 = vrot.slane %v811_v60, %v3879_v2 }
 0x276   :  { %1076 = vmatpush1.msra.mxu0 %v3020_v6  ;;  %2518 = vmatpush3.msra.mxu1 %v3037_v11  ;;  %v977_v11 = vrot.slane %v762_v5, 1 }
 0x277   :  { %1077 = vmatprep.subr.mxu0 %v3024_v7  ;;  %2519 = vmatprep.subr.mxu1 %v3860_v28 }
 0x278   :  { %1078 = vmatpush1.msra.mxu0 %v3030_v9  ;;  %2520 = vmatpush3.msra.mxu1 %v3047_v14 }
 0x279   :  { %1079 = vmatprep.subr.mxu0 %v3034_v10  ;;  %2521 = vmatprep.subr.mxu1 %v3860_v28 }
 0x27a   :  { %1080 = vmatpush1.msra.mxu0 %v3040_v12  ;;  %2522 = vmatpush3.msra.mxu1 %v3057_v17  ;;  %v824_v17 = vrot.slane %v811_v60, %v3211_v42  ;;  %v3479_v60 = vld [vmem:[#allocation12 + $0xa0] sm:$0xff] }
 0x27b   :  { %1081 = vmatprep.subr.mxu0 %v3044_v13  ;;  %2523 = vmatprep.subr.mxu1 %v3860_v28 }
 0x27c   :  { %1082 = vmatpush1.msra.mxu0 %v3050_v15  ;;  %2524 = vmatpush3.msra.mxu1 %v3067_v20 }
 0x27d   :  { %1083 = vmatprep.subr.mxu0 %v3054_v16  ;;  %2525 = vmatprep.subr.mxu1 %v3860_v28 }
 0x27e   :  { %1084 = vmatpush1.msra.mxu0 %v3060_v18  ;;  %2526 = vmatpush3.msra.mxu1 %v3077_v23 }
 0x27f   :  { %1085 = vmatprep.subr.mxu0 %v3064_v19  ;;  %2527 = vmatprep.subr.mxu1 %v3860_v28 }
 0x280   :  { %1086 = vmatpush1.msra.mxu0 %v3070_v21  ;;  %2528 = vmatpush3.msra.mxu1 %v3087_v26 }
 0x281   :  { %1087 = vmatprep.subr.mxu0 %v3074_v22  ;;  %2529 = vmatprep.subr.mxu1 %v3860_v28  ;;  %v987_v22 = vrot.slane %v762_v5, 2 }
 0x282   :  { %1088 = vmatpush1.msra.mxu0 %v3080_v24  ;;  %2530 = vmatpush3.msra.mxu1 %v3097_v29 }
 0x283   :  { %1089 = vmatprep.subr.mxu0 %v3084_v25  ;;  %2531 = vmatprep.subr.mxu1 %v3860_v28 }
 0x284   :  { %1090 = vmatpush1.msra.mxu0 %v3870_v52  ;;  %2532 = vmatpush3.msra.mxu1 %v3871_v53  ;;  %v3457_v52 = vld [vmem:[#allocation12 + $0xc8] sm:$0xff]  ;;  %v3459_v53 = vld [vmem:[#allocation12 + $0xc0] sm:$0xff] }
 0x285   :  { %1091 = vmatprep.subr.mxu0 %v3872_v54  ;;  %2533 = vmatprep.subr.mxu1 %v3860_v28  ;;  %v3461_v54 = vld [vmem:[#allocation12 + $0xd0] sm:$0xff] }
 0x286   :  { %1092 = vmatpush1.msra.mxu0 %v3873_v55  ;;  %2534 = vmatpush3.msra.mxu1 %v3874_v56  ;;  %v3465_v55 = vld [vmem:[#allocation12 + $0xb0] sm:$0xff]  ;;  %v3467_v56 = vld [vmem:[#allocation12 + $0xa8] sm:$0xff] }
 0x287   :  { %1093 = vmatprep.subr.mxu0 %v3875_v57  ;;  %2535 = vmatprep.subr.mxu1 %v3860_v28  ;;  %v3469_v57 = vld [vmem:[#allocation12 + $0xb8] sm:$0xff] }
 0x288   :  { %1094 = vmatpush1.msra.mxu0 %v3876_v58  ;;  %1127 = vmatprep.mubr.f32.mxu0 %v3860_v28  ;;  %v3473_v58 = vld [vmem:[#allocation12 + $0x98] sm:$0xff] }
 0x289   :  { %2536 = vmatpush3.msra.mxu1 %v3877_v59  ;;  %2537 = vmatprep.mubr.msk.f32.mxu1 %vm2892_vm0, %v3860_v28  ;;  %v3477_v59 = vld [vmem:[#allocation12 + $0x90] sm:$0xff] }
 0x28a   :  { %2540 = vmatprep.subr.mxu1 %v3860_v28  ;;  %1298 = vmatprep.subr.mxu0 %v3388_v4 }
 0x329   :  { %v894_v63 = vpop.f32.mrf.mxu0  ;;  %v965_v0 = vpop.f32.mrf.mxu1 }
 0x32a   :  { %v895_v1 = vadd.f32 %v894_v63, %v816_v62  ;;  %v966_v19 = vadd.f32 %v965_v0, %v824_v17  ;;  %v3483_v62 = vld [vmem:[#allocation12 + $0x80] sm:$0xff]  ;;  %v3487_v63 = vld [vmem:[#allocation12 + $0x78] sm:$0xff]  ;;  %v3489_v0 = vld [vmem:[#allocation12 + $0x88] sm:$0xff] }
 0x32b   :  { %v896_v6 = vpop.f32.mrf.mxu0  ;;  %v2504_v7 = vpop.f32.mrf.mxu1  ;;  %v3539_v17 = vld [vmem:[#allocation12 + $0x10] sm:$0xff] }
 0x32c   :  { %v969_v8 = vadd.f32 %v895_v1, %v762_v5  ;;  %v897_v10 = vadd.f32 %v896_v6, %v820_v3  ;;  %v3493_v1 = vld [vmem:[#allocation12 + $0x68] sm:$0xff]  ;;  %v3497_v3 = vld [vmem:[#allocation12 + $0x60] sm:$0xff]  ;;  %v3499_v5 = vld [vmem:[#allocation12 + $0x70] sm:$0xff]  ;;  %3888 = vst [vmem:[#allocation26_spill] sm:$0xff] %v3539_v17 }
 0x32d   :  { %v3503_v6 = vld [vmem:[#allocation12 + $0x50] sm:$0xff]  ;;  %v3507_v7 = vld [vmem:[#allocation12 + $0x48] sm:$0xff] }
 0x32e   :  { %v2200_v9 = vmul.f32 -1.442695, %v969_v8  ;;  %v979_v12 = vadd.f32 %v977_v11, %v897_v10  ;;  %v3509_v8 = vld [vmem:[#allocation12 + $0x58] sm:$0xff]  ;;  %v3517_v10 = vld [vmem:[#allocation12 + $0x30] sm:$0xff]  ;;  %v3519_v11 = vld [vmem:[#allocation12 + $0x40] sm:$0xff] }
 0x32f   :  { %3881 = vst [vmem:[#allocation19_spill] sm:$0xff] %v3517_v10  ;;  %3882 = vst [vmem:[#allocation23_spill] sm:$0xff] %v3519_v11 }
 0x330   :  { %2719 = vpow2.f32 %v2200_v9  ;;  %v2201_v13 = vmul.f32 -1.442695, %v979_v12  ;;  %v3513_v9 = vld [vmem:[#allocation12 + $0x38] sm:$0xff]  ;;  %v3523_v12 = vld [vmem:[#allocation12 + $0x20] sm:$0xff] }
 0x331   :  { %3883 = vst [vmem:[#allocation20_spill] sm:$0xff] %v3523_v12 }
 0x332   :  { %2721 = vpow2.f32 %v2201_v13  ;;  %v3527_v13 = vld [vmem:[#allocation12 + $0x18] sm:$0xff] }
 0x333   :  { %3884 = vst [vmem:[#allocation21_spill] sm:$0xff] %v3527_v13 }
 0x33d   :  { %v2720_v14 = vpop.eup %2719 }
 0x33e   :  { %v973_v15 = vadd.f32 1.0, %v2720_v14  ;;  %v3529_v14 = vld [vmem:[#allocation12 + $0x28] sm:$0xff] }
 0x33f   :  { %v2722_v16 = vpop.eup %2721  ;;  %3885 = vst [vmem:[#allocation25_spill] sm:$0xff] %v3529_v14 }
 0x340   :  { %2723 = vrcp.f32 %v973_v15  ;;  %v983_v18 = vadd.f32 1.0, %v2722_v16  ;;  %v3533_v15 = vld [vmem:[#allocation12 + $0x8] sm:$0xff]  ;;  %v3537_v16 = vld [vmem:[#allocation12] sm:$0xff] }
 0x341   :  { %3886 = vst [vmem:[#allocation22_spill] sm:$0xff] %v3533_v15  ;;  %3887 = vst [vmem:[#allocation24_spill] sm:$0xff] %v3537_v16 }
 0x342   :  { %2725 = vrcp.f32 %v983_v18  ;;  %v1046_v18 = vld [vmem:[%s3806_s6] sm:$0x7] }
 0x34d   :  { %v2724_v20 = vpop.eup %2723 }
 0x34e   :  { %v986_v21 = vmul.f32 %v2724_v20, %v966_v19  ;;  %v1051_v19 = vrot.slane %v1046_v18, %v3878_v61 }
 0x34f   :  { %v2726_v24 = vpop.eup %2725 }
 0x350   :  { %v989_v23 = vadd.f32 %v987_v22, %v986_v21  ;;  %v991_v25 = vsub.f32 1.0, %v2726_v24  ;;  %v993_v29 = vmul.f32 %v2726_v24, %v3302_v39  ;;  %v3453_v39 = vld [vmem:[#allocation12 + $0xe8] sm:$0xff] }
 0x351   :  { %v997_v24 = vld [vmem:[#allocation3 + $0x3] ss:$8 sm:$0x7] }
 0x352   :  { %2727 = vtanh.f32 %v989_v23  ;;  %v1055_v23 = vrot.slane %v1046_v18, %v3879_v2 }
 0x35f   :  { %v2728_v26 = vpop.eup %2727 }
 0x360   :  { %v992_v27 = vmul.f32 %v2728_v26, %v991_v25 }
 0x362   :  { %v3380_v32 = vadd.f32 %v993_v29, %v992_v27 }
 0x364   :  { %995 = vst [vmem:[#allocation4 + $0x2] sm:$0x1] %v3380_v32  ;;  %1128 = vmatmul.mubr.f32.vlgmr.msra.gmra.mxu0 %v3380_v32  ;;  %2538 = vmatmul.mubr.f32.vlgmr.msra.gmra.mxu1 %v3380_v32 }
 0x365   :  { %1362 = vmatprep.mubr.f32.mxu0 %v3860_v28  ;;  %2572 = vmatprep.mubr.msk.f32.mxu1 %vm2892_vm0, %v3860_v28 }
 0x366   :  { %1299 = vmatpush1.msra.mxu0 %v3391_v30  ;;  %2541 = vmatpush3.msra.mxu1 %v3393_v31 }
 0x367   :  { %1300 = vmatprep.subr.mxu0 %v3397_v34  ;;  %2542 = vmatprep.subr.mxu1 %v3860_v28 }
 0x368   :  { %1301 = vmatpush1.msra.mxu0 %v3401_v48  ;;  %2543 = vmatpush3.msra.mxu1 %v3403_v49 }
 0x369   :  { %1302 = vmatprep.subr.mxu0 %v3407_v50  ;;  %2544 = vmatprep.subr.mxu1 %v3860_v28 }
 0x36a   :  { %1303 = vmatpush1.msra.mxu0 %v3411_v33  ;;  %2545 = vmatpush3.msra.mxu1 %v3413_v40 }
 0x36b   :  { %1304 = vmatprep.subr.mxu0 %v3417_v44  ;;  %2546 = vmatprep.subr.mxu1 %v3860_v28 }
 0x36c   :  { %1305 = vmatpush1.msra.mxu0 %v3421_v45  ;;  %2547 = vmatpush3.msra.mxu1 %v3423_v38 }
 0x36d   :  { %1306 = vmatprep.subr.mxu0 %v3427_v51  ;;  %2548 = vmatprep.subr.mxu1 %v3860_v28 }
 0x36e   :  { %1307 = vmatpush1.msra.mxu0 %v3431_v37  ;;  %2549 = vmatpush3.msra.mxu1 %v3433_v36 }
 0x36f   :  { %1308 = vmatprep.subr.mxu0 %v3437_v46  ;;  %2550 = vmatprep.subr.mxu1 %v3860_v28 }
 0x370   :  { %1309 = vmatpush1.msra.mxu0 %v3441_v43  ;;  %2551 = vmatpush3.msra.mxu1 %v3443_v47 }
 0x371   :  { %1310 = vmatprep.subr.mxu0 %v3447_v41  ;;  %2552 = vmatprep.subr.mxu1 %v3860_v28 }
 0x372   :  { %1311 = vmatpush1.msra.mxu0 %v3451_v35  ;;  %2553 = vmatpush3.msra.mxu1 %v3453_v39 }
 0x373   :  { %1312 = vmatprep.subr.mxu0 %v3457_v52  ;;  %2554 = vmatprep.subr.mxu1 %v3860_v28 }
 0x374   :  { %1313 = vmatpush1.msra.mxu0 %v3459_v53  ;;  %2555 = vmatpush3.msra.mxu1 %v3461_v54 }
 0x375   :  { %1314 = vmatprep.subr.mxu0 %v3465_v55  ;;  %2556 = vmatprep.subr.mxu1 %v3860_v28 }
 0x376   :  { %1315 = vmatpush1.msra.mxu0 %v3467_v56  ;;  %2557 = vmatpush3.msra.mxu1 %v3469_v57 }
 0x377   :  { %1316 = vmatprep.subr.mxu0 %v3473_v58  ;;  %2558 = vmatprep.subr.mxu1 %v3860_v28 }
 0x378   :  { %1317 = vmatpush1.msra.mxu0 %v3477_v59  ;;  %2559 = vmatpush3.msra.mxu1 %v3479_v60 }
 0x379   :  { %1318 = vmatprep.subr.mxu0 %v3483_v62  ;;  %2560 = vmatprep.subr.mxu1 %v3860_v28 }
 0x37a   :  { %1319 = vmatpush1.msra.mxu0 %v3487_v63  ;;  %2561 = vmatpush3.msra.mxu1 %v3489_v0 }
 0x37b   :  { %1320 = vmatprep.subr.mxu0 %v3493_v1  ;;  %2562 = vmatprep.subr.mxu1 %v3860_v28 }
 0x37c   :  { %1321 = vmatpush1.msra.mxu0 %v3497_v3  ;;  %2563 = vmatpush3.msra.mxu1 %v3499_v5 }
 0x37d   :  { %1322 = vmatprep.subr.mxu0 %v3503_v6  ;;  %2564 = vmatprep.subr.mxu1 %v3860_v28 }
 0x37e   :  { %1323 = vmatpush1.msra.mxu0 %v3507_v7  ;;  %2565 = vmatpush3.msra.mxu1 %v3509_v8 }
 0x37f   :  { %1324 = vmatprep.subr.mxu0 %v3513_v9  ;;  %2566 = vmatprep.subr.mxu1 %v3860_v28 }
 0x380   :  { %1325 = vmatpush1.msra.mxu0 %v3517_v10  ;;  %2567 = vmatpush3.msra.mxu1 %v3519_v11  ;;  %v1222_v10 = vrot.slane %v997_v24, 2 }
 0x381   :  { %1326 = vmatprep.subr.mxu0 %v3523_v12  ;;  %2568 = vmatprep.subr.mxu1 %v3860_v28  ;;  %v1059_v12 = vrot.slane %v1046_v18, %v3211_v42  ;;  %v1281_v18 = vld [vmem:[%s3806_s6] sm:$0x7] }
 0x382   :  { %1327 = vmatpush1.msra.mxu0 %v3527_v13  ;;  %2569 = vmatpush3.msra.mxu1 %v3529_v14 }
 0x383   :  { %1328 = vmatprep.subr.mxu0 %v3533_v15  ;;  %2570 = vmatprep.subr.mxu1 %v3860_v28 }
 0x384   :  { %1329 = vmatpush1.msra.mxu0 %v3537_v16  ;;  %2571 = vmatpush3.msra.mxu1 %v3539_v17 }
 0x385   :  { %1533 = vmatprep.subr.mxu0 %v3388_v4  ;;  %2575 = vmatprep.subr.mxu1 %v3860_v28  ;;  %v1212_v4 = vrot.slane %v997_v24, 1 }
 0x424   :  { %v1129_v20 = vpop.f32.mrf.mxu0  ;;  %v1200_v21 = vpop.f32.mrf.mxu1 }
 0x425   :  { %v1130_v22 = vadd.f32 %v1129_v20, %v1051_v19  ;;  %v1201_v20 = vadd.f32 %v1200_v21, %v1059_v12  ;;  %v3894_v12 = vld [vmem:[#allocation22_spill] sm:$0xff]  ;;  %v3898_v21 = vld [vmem:[#allocation27_spill] sm:$0xff] }
 0x426   :  { %v1131_v25 = vpop.f32.mrf.mxu0  ;;  %v2539_v26 = vpop.f32.mrf.mxu1 }
 0x427   :  { %v1204_v27 = vadd.f32 %v1130_v22, %v997_v24  ;;  %v1132_v17 = vadd.f32 %v1131_v25, %v1055_v23  ;;  %v1286_v24 = vrot.slane %v1281_v18, %v3898_v21 }
 0x429   :  { %v2202_v29 = vmul.f32 -1.442695, %v1204_v27  ;;  %v1214_v16 = vadd.f32 %v1212_v4, %v1132_v17  ;;  %v3897_v17 = vld [vmem:[#allocation18_spill] sm:$0xff] }
 0x42b   :  { %2729 = vpow2.f32 %v2202_v29  ;;  %v2203_v15 = vmul.f32 -1.442695, %v1214_v16 }
 0x42d   :  { %2731 = vpow2.f32 %v2203_v15 }
 0x438   :  { %v2730_v14 = vpop.eup %2729 }
 0x439   :  { %v1208_v13 = vadd.f32 1.0, %v2730_v14  ;;  %v3896_v14 = vld [vmem:[#allocation26_spill] sm:$0xff] }
 0x43a   :  { %v2732_v61 = vpop.eup %2731 }
 0x43b   :  { %2733 = vrcp.f32 %v1208_v13  ;;  %v1218_v19 = vadd.f32 1.0, %v2732_v61  ;;  %v3889_v61 = vld [vmem:[#allocation19_spill] sm:$0xff]  ;;  %v3895_v13 = vld [vmem:[#allocation24_spill] sm:$0xff] }
 0x43d   :  { %2735 = vrcp.f32 %v1218_v19 }
 0x448   :  { %v2734_v2 = vpop.eup %2733 }
 0x449   :  { %v1221_v11 = vmul.f32 %v2734_v2, %v1201_v20  ;;  %v3890_v2 = vld [vmem:[#allocation23_spill] sm:$0xff]  ;;  %v3899_v20 = vld [vmem:[#allocation28_spill] sm:$0xff] }
 0x44a   :  { %v2736_v23 = vpop.eup %2735 }
 0x44b   :  { %v1224_v22 = vadd.f32 %v1222_v10, %v1221_v11  ;;  %v1226_v25 = vsub.f32 1.0, %v2736_v23  ;;  %v1228_v15 = vmul.f32 %v2736_v23, %v3380_v32  ;;  %v3891_v32 = vld [vmem:[#allocation20_spill] sm:$0xff]  ;;  %v3892_v10 = vld [vmem:[#allocation21_spill] sm:$0xff] }
 0x44c   :  { %v3893_v11 = vld [vmem:[#allocation25_spill] sm:$0xff] }
 0x44d   :  { %2737 = vtanh.f32 %v1224_v22  ;;  %v1290_v22 = vrot.slane %v1281_v18, %v3899_v20  ;;  %v1232_v23 = vld [vmem:[#allocation3 + $0x4] ss:$8 sm:$0x7] }
 0x45a   :  { %v2738_v26 = vpop.eup %2737 }
 0x45b   :  { %v1227_v4 = vmul.f32 %v2738_v26, %v1226_v25 }
 0x45d   :  { %v3556_v16 = vadd.f32 %v1228_v15, %v1227_v4 }
 0x45f   :  { %1230 = vst [vmem:[#allocation4 + $0x3] sm:$0x1] %v3556_v16  ;;  %1363 = vmatmul.mubr.f32.vlgmr.msra.gmra.mxu0 %v3556_v16  ;;  %2573 = vmatmul.mubr.f32.vlgmr.msra.gmra.mxu1 %v3556_v16 }
 0x460   :  { %1534 = vmatpush1.msra.mxu0 %v3391_v30  ;;  %2576 = vmatpush3.msra.mxu1 %v3393_v31 }
 0x461   :  { %1535 = vmatprep.subr.mxu0 %v3397_v34  ;;  %2577 = vmatprep.subr.mxu1 %v3860_v28 }
 0x462   :  { %1536 = vmatpush1.msra.mxu0 %v3401_v48  ;;  %2578 = vmatpush3.msra.mxu1 %v3403_v49 }
 0x463   :  { %1537 = vmatprep.subr.mxu0 %v3407_v50  ;;  %2579 = vmatprep.subr.mxu1 %v3860_v28 }
 0x464   :  { %1538 = vmatpush1.msra.mxu0 %v3411_v33  ;;  %2580 = vmatpush3.msra.mxu1 %v3413_v40 }
 0x465   :  { %1539 = vmatprep.subr.mxu0 %v3417_v44  ;;  %2581 = vmatprep.subr.mxu1 %v3860_v28 }
 0x466   :  { %1540 = vmatpush1.msra.mxu0 %v3421_v45  ;;  %2582 = vmatpush3.msra.mxu1 %v3423_v38 }
 0x467   :  { %1541 = vmatprep.subr.mxu0 %v3427_v51  ;;  %2583 = vmatprep.subr.mxu1 %v3860_v28 }
 0x468   :  { %1542 = vmatpush1.msra.mxu0 %v3431_v37  ;;  %2584 = vmatpush3.msra.mxu1 %v3433_v36 }
 0x469   :  { %1543 = vmatprep.subr.mxu0 %v3437_v46  ;;  %2585 = vmatprep.subr.mxu1 %v3860_v28 }
 0x46a   :  { %1544 = vmatpush1.msra.mxu0 %v3441_v43  ;;  %2586 = vmatpush3.msra.mxu1 %v3443_v47 }
 0x46b   :  { %1545 = vmatprep.subr.mxu0 %v3447_v41  ;;  %2587 = vmatprep.subr.mxu1 %v3860_v28 }
 0x46c   :  { %1546 = vmatpush1.msra.mxu0 %v3451_v35  ;;  %2588 = vmatpush3.msra.mxu1 %v3453_v39 }
 0x46d   :  { %1547 = vmatprep.subr.mxu0 %v3457_v52  ;;  %2589 = vmatprep.subr.mxu1 %v3860_v28 }
 0x46e   :  { %1548 = vmatpush1.msra.mxu0 %v3459_v53  ;;  %2590 = vmatpush3.msra.mxu1 %v3461_v54 }
 0x46f   :  { %1549 = vmatprep.subr.mxu0 %v3465_v55  ;;  %2591 = vmatprep.subr.mxu1 %v3860_v28 }
 0x470   :  { %1550 = vmatpush1.msra.mxu0 %v3467_v56  ;;  %2592 = vmatpush3.msra.mxu1 %v3469_v57 }
 0x471   :  { %1551 = vmatprep.subr.mxu0 %v3473_v58  ;;  %2593 = vmatprep.subr.mxu1 %v3860_v28 }
 0x472   :  { %1552 = vmatpush1.msra.mxu0 %v3477_v59  ;;  %2594 = vmatpush3.msra.mxu1 %v3479_v60 }
 0x473   :  { %1553 = vmatprep.subr.mxu0 %v3483_v62  ;;  %2595 = vmatprep.subr.mxu1 %v3860_v28 }
 0x474   :  { %1554 = vmatpush1.msra.mxu0 %v3487_v63  ;;  %2596 = vmatpush3.msra.mxu1 %v3489_v0 }
 0x475   :  { %1555 = vmatprep.subr.mxu0 %v3493_v1  ;;  %2597 = vmatprep.subr.mxu1 %v3860_v28 }
 0x476   :  { %1556 = vmatpush1.msra.mxu0 %v3497_v3  ;;  %2598 = vmatpush3.msra.mxu1 %v3499_v5 }
 0x477   :  { %1557 = vmatprep.subr.mxu0 %v3503_v6  ;;  %2599 = vmatprep.subr.mxu1 %v3860_v28 }
 0x478   :  { %1558 = vmatpush1.msra.mxu0 %v3507_v7  ;;  %2600 = vmatpush3.msra.mxu1 %v3509_v8 }
 0x479   :  { %1559 = vmatprep.subr.mxu0 %v3513_v9  ;;  %2601 = vmatprep.subr.mxu1 %v3860_v28 }
 0x47a   :  { %1560 = vmatpush1.msra.mxu0 %v3889_v61  ;;  %2602 = vmatpush3.msra.mxu1 %v3890_v2  ;;  %v1457_v61 = vrot.slane %v1232_v23, 2 }
 0x47b   :  { %1561 = vmatprep.subr.mxu0 %v3891_v32  ;;  %2603 = vmatprep.subr.mxu1 %v3860_v28  ;;  %v1294_v32 = vrot.slane %v1281_v18, %v3211_v42  ;;  %v3907_v18 = vld [vmem:[#allocation26_spill] sm:$0xff] }
 0x47c   :  { %1562 = vmatpush1.msra.mxu0 %v3892_v10  ;;  %2604 = vmatpush3.msra.mxu1 %v3893_v11 }
 0x47d   :  { %1563 = vmatprep.subr.mxu0 %v3894_v12  ;;  %2605 = vmatprep.subr.mxu1 %v3860_v28 }
 0x47e   :  { %1564 = vmatpush1.msra.mxu0 %v3895_v13  ;;  %1597 = vmatprep.mubr.f32.mxu0 %v3860_v28 }
 0x47f   :  { %2606 = vmatpush3.msra.mxu1 %v3896_v14  ;;  %2607 = vmatprep.mubr.msk.f32.mxu1 %vm2892_vm0, %v3860_v28 }
 0x480   :  { %1768 = vmatprep.subr.mxu0 %v3897_v17  ;;  %2610 = vmatprep.subr.mxu1 %v3860_v28  ;;  %v1447_v17 = vrot.slane %v1232_v23, 1 }
 0x51f   :  { %v1364_v27 = vpop.f32.mrf.mxu0  ;;  %v1435_v29 = vpop.f32.mrf.mxu1 }
 0x520   :  { %v1365_v19 = vadd.f32 %v1364_v27, %v1286_v24  ;;  %v1436_v27 = vadd.f32 %v1435_v29, %v1294_v32  ;;  %v3903_v32 = vld [vmem:[#allocation21_spill] sm:$0xff]  ;;  %v1516_v29 = vld [vmem:[%s3806_s6] sm:$0x7] }
 0x521   :  { %v1366_v25 = vpop.f32.mrf.mxu0  ;;  %v2574_v26 = vpop.f32.mrf.mxu1 }
 0x522   :  { %v1439_v4 = vadd.f32 %v1365_v19, %v1232_v23  ;;  %v1367_v14 = vadd.f32 %v1366_v25, %v1290_v22 }
 0x524   :  { %v2204_v15 = vmul.f32 -1.442695, %v1439_v4  ;;  %v1449_v13 = vadd.f32 %v1447_v17, %v1367_v14  ;;  %v3906_v17 = vld [vmem:[#allocation24_spill] sm:$0xff] }
 0x526   :  { %2739 = vpow2.f32 %v2204_v15  ;;  %v2205_v12 = vmul.f32 -1.442695, %v1449_v13 }
 0x528   :  { %2741 = vpow2.f32 %v2205_v12 }
 0x533   :  { %v2740_v11 = vpop.eup %2739 }
 0x534   :  { %v1443_v10 = vadd.f32 1.0, %v2740_v11  ;;  %v3905_v11 = vld [vmem:[#allocation22_spill] sm:$0xff] }
 0x535   :  { %v2742_v21 = vpop.eup %2741 }
 0x536   :  { %2743 = vrcp.f32 %v1443_v10  ;;  %v1453_v24 = vadd.f32 1.0, %v2742_v21  ;;  %v3904_v10 = vld [vmem:[#allocation25_spill] sm:$0xff]  ;;  %v3908_v21 = vld [vmem:[#allocation18_spill] sm:$0xff] }
 0x538   :  { %2745 = vrcp.f32 %v1453_v24 }
 0x543   :  { %v2744_v20 = vpop.eup %2743 }
 0x544   :  { %v1456_v2 = vmul.f32 %v2744_v20, %v1436_v27  ;;  %v3909_v20 = vld [vmem:[#allocation27_spill] sm:$0xff]  ;;  %v3910_v27 = vld [vmem:[#allocation28_spill] sm:$0xff] }
 0x545   :  { %v2746_v22 = vpop.eup %2745  ;;  %v1521_v23 = vrot.slane %v1516_v29, %v3909_v20 }
 0x546   :  { %v1459_v19 = vadd.f32 %v1457_v61, %v1456_v2  ;;  %v1461_v25 = vsub.f32 1.0, %v2746_v22  ;;  %v1463_v12 = vmul.f32 %v2746_v22, %v3556_v16  ;;  %v3900_v16 = vld [vmem:[#allocation19_spill] sm:$0xff]  ;;  %v3902_v2 = vld [vmem:[#allocation20_spill] sm:$0xff] }
 0x547   :  { %v3901_v61 = vld [vmem:[#allocation23_spill] sm:$0xff] }
 0x548   :  { %2747 = vtanh.f32 %v1459_v19  ;;  %v1525_v19 = vrot.slane %v1516_v29, %v3910_v27  ;;  %v1467_v22 = vld [vmem:[#allocation3 + $0x5] ss:$8 sm:$0x7] }
 0x555   :  { %v2748_v26 = vpop.eup %2747 }
 0x556   :  { %v1462_v14 = vmul.f32 %v2748_v26, %v1461_v25 }
 0x558   :  { %v3635_v13 = vadd.f32 %v1463_v12, %v1462_v14 }
 0x55a   :  { %1465 = vst [vmem:[#allocation4 + $0x4] sm:$0x1] %v3635_v13  ;;  %1598 = vmatmul.mubr.f32.vlgmr.msra.gmra.mxu0 %v3635_v13  ;;  %2608 = vmatmul.mubr.f32.vlgmr.msra.gmra.mxu1 %v3635_v13 }
 0x55b   :  { %1769 = vmatpush1.msra.mxu0 %v3391_v30  ;;  %2611 = vmatpush3.msra.mxu1 %v3393_v31 }
 0x55c   :  { %1770 = vmatprep.subr.mxu0 %v3397_v34  ;;  %2612 = vmatprep.subr.mxu1 %v3860_v28 }
 0x55d   :  { %1771 = vmatpush1.msra.mxu0 %v3401_v48  ;;  %2613 = vmatpush3.msra.mxu1 %v3403_v49 }
 0x55e   :  { %1772 = vmatprep.subr.mxu0 %v3407_v50  ;;  %2614 = vmatprep.subr.mxu1 %v3860_v28 }
 0x55f   :  { %1773 = vmatpush1.msra.mxu0 %v3411_v33  ;;  %2615 = vmatpush3.msra.mxu1 %v3413_v40 }
 0x560   :  { %1774 = vmatprep.subr.mxu0 %v3417_v44  ;;  %2616 = vmatprep.subr.mxu1 %v3860_v28 }
 0x561   :  { %1775 = vmatpush1.msra.mxu0 %v3421_v45  ;;  %2617 = vmatpush3.msra.mxu1 %v3423_v38 }
 0x562   :  { %1776 = vmatprep.subr.mxu0 %v3427_v51  ;;  %2618 = vmatprep.subr.mxu1 %v3860_v28 }
 0x563   :  { %1777 = vmatpush1.msra.mxu0 %v3431_v37  ;;  %2619 = vmatpush3.msra.mxu1 %v3433_v36 }
 0x564   :  { %1778 = vmatprep.subr.mxu0 %v3437_v46  ;;  %2620 = vmatprep.subr.mxu1 %v3860_v28 }
 0x565   :  { %1779 = vmatpush1.msra.mxu0 %v3441_v43  ;;  %2621 = vmatpush3.msra.mxu1 %v3443_v47 }
 0x566   :  { %1780 = vmatprep.subr.mxu0 %v3447_v41  ;;  %2622 = vmatprep.subr.mxu1 %v3860_v28 }
 0x567   :  { %1781 = vmatpush1.msra.mxu0 %v3451_v35  ;;  %2623 = vmatpush3.msra.mxu1 %v3453_v39 }
 0x568   :  { %1782 = vmatprep.subr.mxu0 %v3457_v52  ;;  %2624 = vmatprep.subr.mxu1 %v3860_v28 }
 0x569   :  { %1783 = vmatpush1.msra.mxu0 %v3459_v53  ;;  %2625 = vmatpush3.msra.mxu1 %v3461_v54 }
 0x56a   :  { %1784 = vmatprep.subr.mxu0 %v3465_v55  ;;  %2626 = vmatprep.subr.mxu1 %v3860_v28 }
 0x56b   :  { %1785 = vmatpush1.msra.mxu0 %v3467_v56  ;;  %2627 = vmatpush3.msra.mxu1 %v3469_v57 }
 0x56c   :  { %1786 = vmatprep.subr.mxu0 %v3473_v58  ;;  %2628 = vmatprep.subr.mxu1 %v3860_v28 }
 0x56d   :  { %1787 = vmatpush1.msra.mxu0 %v3477_v59  ;;  %2629 = vmatpush3.msra.mxu1 %v3479_v60 }
 0x56e   :  { %1788 = vmatprep.subr.mxu0 %v3483_v62  ;;  %2630 = vmatprep.subr.mxu1 %v3860_v28 }
 0x56f   :  { %1789 = vmatpush1.msra.mxu0 %v3487_v63  ;;  %2631 = vmatpush3.msra.mxu1 %v3489_v0 }
 0x570   :  { %1790 = vmatprep.subr.mxu0 %v3493_v1  ;;  %2632 = vmatprep.subr.mxu1 %v3860_v28 }
 0x571   :  { %1791 = vmatpush1.msra.mxu0 %v3497_v3  ;;  %2633 = vmatpush3.msra.mxu1 %v3499_v5 }
 0x572   :  { %1792 = vmatprep.subr.mxu0 %v3503_v6  ;;  %2634 = vmatprep.subr.mxu1 %v3860_v28 }
 0x573   :  { %1793 = vmatpush1.msra.mxu0 %v3507_v7  ;;  %2635 = vmatpush3.msra.mxu1 %v3509_v8 }
 0x574   :  { %1794 = vmatprep.subr.mxu0 %v3513_v9  ;;  %2636 = vmatprep.subr.mxu1 %v3860_v28 }
 0x575   :  { %1795 = vmatpush1.msra.mxu0 %v3900_v16  ;;  %2637 = vmatpush3.msra.mxu1 %v3901_v61  ;;  %v1692_v16 = vrot.slane %v1467_v22, 2 }
 0x576   :  { %1796 = vmatprep.subr.mxu0 %v3902_v2  ;;  %2638 = vmatprep.subr.mxu1 %v3860_v28  ;;  %v1529_v2 = vrot.slane %v1516_v29, %v3211_v42 }
 0x577   :  { %1797 = vmatpush1.msra.mxu0 %v3903_v32  ;;  %2639 = vmatpush3.msra.mxu1 %v3904_v10 }
 0x578   :  { %1798 = vmatprep.subr.mxu0 %v3905_v11  ;;  %2640 = vmatprep.subr.mxu1 %v3860_v28 }
 0x579   :  { %1799 = vmatpush1.msra.mxu0 %v3906_v17  ;;  %1832 = vmatprep.mubr.f32.mxu0 %v3860_v28 }
 0x57a   :  { %2641 = vmatpush3.msra.mxu1 %v3907_v18  ;;  %2642 = vmatprep.mubr.msk.f32.mxu1 %vm2892_vm0, %v3860_v28 }
 0x57b   :  { %2003 = vmatprep.subr.mxu0 %v3908_v21  ;;  %2645 = vmatprep.subr.mxu1 %v3860_v28  ;;  %v1682_v21 = vrot.slane %v1467_v22, 1 }
 0x61a   :  { %v1599_v4 = vpop.f32.mrf.mxu0  ;;  %v1670_v15 = vpop.f32.mrf.mxu1 }
 0x61b   :  { %v1600_v24 = vadd.f32 %v1599_v4, %v1521_v23  ;;  %v1671_v4 = vadd.f32 %v1670_v15, %v1529_v2 }
 0x61c   :  { %v1601_v25 = vpop.f32.mrf.mxu0  ;;  %v2609_v26 = vpop.f32.mrf.mxu1 }
 0x61d   :  { %v1674_v14 = vadd.f32 %v1600_v24, %v1467_v22  ;;  %v1602_v18 = vadd.f32 %v1601_v25, %v1525_v19 }
 0x61f   :  { %v2206_v12 = vmul.f32 -1.442695, %v1674_v14  ;;  %v1684_v17 = vadd.f32 %v1682_v21, %v1602_v18 }
 0x621   :  { %2749 = vpow2.f32 %v2206_v12  ;;  %v2207_v11 = vmul.f32 -1.442695, %v1684_v17 }
 0x623   :  { %2751 = vpow2.f32 %v2207_v11 }
 0x62e   :  { %v2750_v10 = vpop.eup %2749 }
 0x62f   :  { %v1678_v32 = vadd.f32 1.0, %v2750_v10 }
 0x630   :  { %v2752_v20 = vpop.eup %2751 }
 0x631   :  { %2753 = vrcp.f32 %v1678_v32  ;;  %v1688_v23 = vadd.f32 1.0, %v2752_v20  ;;  %v1937_v20 = vld [vmem:[#allocation3 + $0x7] ss:$8 sm:$0x7] }
 0x632   :  { %v2152_v21 = vrot.slane %v1937_v20, 1 }
 0x633   :  { %2755 = vrcp.f32 %v1688_v23 }
 0x63e   :  { %v2754_v27 = vpop.eup %2753 }
 0x63f   :  { %v1691_v61 = vmul.f32 %v2754_v27, %v1671_v4 }
 0x640   :  { %v2756_v19 = vpop.eup %2755 }
 0x641   :  { %v1694_v24 = vadd.f32 %v1692_v16, %v1691_v61  ;;  %v1696_v25 = vsub.f32 1.0, %v2756_v19  ;;  %v1698_v11 = vmul.f32 %v2756_v19, %v3635_v13  ;;  %v1986_v16 = vld [vmem:[%s3806_s6] sm:$0x7] }
 0x643   :  { %2757 = vtanh.f32 %v1694_v24 }
 0x650   :  { %v2758_v26 = vpop.eup %2757 }
 0x651   :  { %v1697_v18 = vmul.f32 %v2758_v26, %v1696_v25  ;;  %v1999_v26 = vrot.slane %v1986_v16, %v3211_v42 }
 0x653   :  { %v3714_v17 = vadd.f32 %v1698_v11, %v1697_v18 }
 0x655   :  { %1700 = vst [vmem:[#allocation4 + $0x5] sm:$0x1] %v3714_v17  ;;  %1833 = vmatmul.mubr.f32.vlgmr.msra.gmra.mxu0 %v3714_v17  ;;  %2643 = vmatmul.mubr.f32.vlgmr.msra.gmra.mxu1 %v3714_v17 }
 0x656   :  { %2004 = vmatpush1.msra.mxu0 %v3391_v30  ;;  %2646 = vmatpush3.msra.mxu1 %v3393_v31  ;;  %v3911_v30 = vld [vmem:[#allocation19_spill] sm:$0xff] }
 0x657   :  { %2005 = vmatprep.subr.mxu0 %v3397_v34  ;;  %2647 = vmatprep.subr.mxu1 %v3860_v28  ;;  %v3912_v31 = vld [vmem:[#allocation23_spill] sm:$0xff]  ;;  %v3913_v34 = vld [vmem:[#allocation20_spill] sm:$0xff] }
 0x658   :  { %2006 = vmatpush1.msra.mxu0 %v3401_v48  ;;  %2648 = vmatpush3.msra.mxu1 %v3403_v49  ;;  %v3914_v48 = vld [vmem:[#allocation21_spill] sm:$0xff] }
 0x659   :  { %2007 = vmatprep.subr.mxu0 %v3407_v50  ;;  %2649 = vmatprep.subr.mxu1 %v3860_v28  ;;  %v3915_v49 = vld [vmem:[#allocation25_spill] sm:$0xff]  ;;  %v3916_v50 = vld [vmem:[#allocation22_spill] sm:$0xff] }
 0x65a   :  { %2008 = vmatpush1.msra.mxu0 %v3411_v33  ;;  %2650 = vmatpush3.msra.mxu1 %v3413_v40  ;;  %v3917_v33 = vld [vmem:[#allocation24_spill] sm:$0xff]  ;;  %v3918_v40 = vld [vmem:[#allocation26_spill] sm:$0xff] }
 0x65b   :  { %2009 = vmatprep.subr.mxu0 %v3417_v44  ;;  %2651 = vmatprep.subr.mxu1 %v3860_v28  ;;  %v1751_v44 = vld [vmem:[%s3806_s6] sm:$0x7]  ;;  %s2893_s6 = smov [#allocation13]  }
 0x65c   :  { %2010 = vmatpush1.msra.mxu0 %v3421_v45  ;;  %2652 = vmatpush3.msra.mxu1 %v3423_v38  ;;  %v3919_v45 = vld [vmem:[#allocation27_spill] sm:$0xff]  ;;  %s2179_s17 = sshll.u32 %s2893_s6, 4  ;;  %s2180_s17 = int_to_ptr.vmem [resolvable:$true] %s2179_s17 }
 0x65d   :  { %2011 = vmatprep.subr.mxu0 %v3427_v51  ;;  %2653 = vmatprep.subr.mxu1 %v3860_v28  ;;  %v1756_v38 = vrot.slane %v1751_v44, %v3919_v45  ;;  %v1991_v61 = vrot.slane %v1986_v16, %v3919_v45  ;;  %s2847_s18 = scalar_lea.vmem %s2180_s17, 128  ;;  %p2852_p3 = scmp.lt.s32.totalorder %s2180_s17, %s2180_s17 }
 0x65e   :  { %2012 = vmatpush1.msra.mxu0 %v3431_v37  ;;  %2654 = vmatpush3.msra.mxu1 %v3433_v36  ;;  %p2848_p2 = scmp.ne.s32.totalorder %s2180_s17, %s2847_s18  ;;  %p2853_p4 = scmp.lt.s32.totalorder %s2847_s18, %s2847_s18 }
 0x65f   :  { %2013 = vmatprep.subr.mxu0 %v3437_v46  ;;  %2655 = vmatprep.subr.mxu1 %v3860_v28  ;;  %v3920_v46 = vld [vmem:[#allocation28_spill] sm:$0xff] }
 0x660   :  { %2014 = vmatpush1.msra.mxu0 %v3441_v43  ;;  %2656 = vmatpush3.msra.mxu1 %v3443_v47  ;;  %v1760_v43 = vrot.slane %v1751_v44, %v3920_v46  ;;  %v1702_v47 = vld [vmem:[#allocation3 + $0x6] ss:$8 sm:$0x7]  ;;  %v1995_v29 = vrot.slane %v1986_v16, %v3920_v46  ;;  %p2854_p5 = por %p2853_p4, %p2852_p3 }
 0x661   :  { %2015 = vmatprep.subr.mxu0 %v3447_v41  ;;  %2657 = vmatprep.subr.mxu1 %v3860_v28 }
 0x662   :  { %2016 = vmatpush1.msra.mxu0 %v3451_v35  ;;  %2658 = vmatpush3.msra.mxu1 %v3453_v39  ;;  %p2855_p6 = pnand %p2854_p5, %p2848_p2 }
 0x663   :  { %2017 = vmatprep.subr.mxu0 %v3457_v52  ;;  %2659 = vmatprep.subr.mxu1 %v3860_v28 }
 0x664   :  { %2018 = vmatpush1.msra.mxu0 %v3459_v53  ;;  %2660 = vmatpush3.msra.mxu1 %v3461_v54  ;;  %v1917_v54 = vrot.slane %v1702_v47, 1 }
 0x665   :  { %2019 = vmatprep.subr.mxu0 %v3465_v55  ;;  %2661 = vmatprep.subr.mxu1 %v3860_v28 }
 0x666   :  { %2020 = vmatpush1.msra.mxu0 %v3467_v56  ;;  %2662 = vmatpush3.msra.mxu1 %v3469_v57 }
 0x667   :  { %2021 = vmatprep.subr.mxu0 %v3473_v58  ;;  %2663 = vmatprep.subr.mxu1 %v3860_v28 }
 0x668   :  { %2022 = vmatpush1.msra.mxu0 %v3477_v59  ;;  %2664 = vmatpush3.msra.mxu1 %v3479_v60  ;;  %v1764_v59 = vrot.slane %v1751_v44, %v3211_v42 }
 0x669   :  { %2023 = vmatprep.subr.mxu0 %v3483_v62  ;;  %2665 = vmatprep.subr.mxu1 %v3860_v28 }
 0x66a   :  { %2024 = vmatpush1.msra.mxu0 %v3487_v63  ;;  %2666 = vmatpush3.msra.mxu1 %v3489_v0 }
 0x66b   :  { %2025 = vmatprep.subr.mxu0 %v3493_v1  ;;  %2667 = vmatprep.subr.mxu1 %v3860_v28  ;;  %v1927_v1 = vrot.slane %v1702_v47, 2 }
 0x66c   :  { %2026 = vmatpush1.msra.mxu0 %v3497_v3  ;;  %2668 = vmatpush3.msra.mxu1 %v3499_v5 }
 0x66d   :  { %2027 = vmatprep.subr.mxu0 %v3503_v6  ;;  %2669 = vmatprep.subr.mxu1 %v3860_v28 }
 0x66e   :  { %2028 = vmatpush1.msra.mxu0 %v3507_v7  ;;  %2670 = vmatpush3.msra.mxu1 %v3509_v8 }
 0x66f   :  { %2029 = vmatprep.subr.mxu0 %v3513_v9  ;;  %2671 = vmatprep.subr.mxu1 %v3860_v28 }
 0x670   :  { %2030 = vmatpush1.msra.mxu0 %v3911_v30  ;;  %2672 = vmatpush3.msra.mxu1 %v3912_v31  ;;  %v2162_v31 = vrot.slane %v1937_v20, 2 }
 0x671   :  { %2031 = vmatprep.subr.mxu0 %v3913_v34  ;;  %2673 = vmatprep.subr.mxu1 %v3860_v28 }
 0x672   :  { %2032 = vmatpush1.msra.mxu0 %v3914_v48  ;;  %2674 = vmatpush3.msra.mxu1 %v3915_v49 }
 0x673   :  { %2033 = vmatprep.subr.mxu0 %v3916_v50  ;;  %2675 = vmatprep.subr.mxu1 %v3860_v28 }
 0x674   :  { %2034 = vmatpush1.msra.mxu0 %v3917_v33  ;;  %2067 = vmatprep.mubr.f32.mxu0 %v3860_v28 }
 0x675   :  { %2676 = vmatpush3.msra.mxu1 %v3918_v40  ;;  %2677 = vmatprep.mubr.msk.f32.mxu1 %vm2892_vm0, %v3860_v28 }
 0x715   :  { %v1834_v51 = vpop.f32.mrf.mxu0  ;;  %v1905_v37 = vpop.f32.mrf.mxu1 }
 0x716   :  { %v1835_v36 = vadd.f32 %v1834_v51, %v1756_v38  ;;  %v1906_v62 = vadd.f32 %v1905_v37, %v1764_v59 }
 0x717   :  { %v1836_v41 = vpop.f32.mrf.mxu0  ;;  %v2644_v35 = vpop.f32.mrf.mxu1 }
 0x718   :  { %v1909_v39 = vadd.f32 %v1835_v36, %v1702_v47  ;;  %v1837_v53 = vadd.f32 %v1836_v41, %v1760_v43 }
 0x71a   :  { %v2208_v52 = vmul.f32 -1.442695, %v1909_v39  ;;  %v1919_v28 = vadd.f32 %v1917_v54, %v1837_v53 }
 0x71c   :  { %2759 = vpow2.f32 %v2208_v52  ;;  %v2209_v55 = vmul.f32 -1.442695, %v1919_v28 }
 0x71e   :  { %2761 = vpow2.f32 %v2209_v55 }
 0x729   :  { %v2760_v56 = vpop.eup %2759 }
 0x72a   :  { %v1913_v57 = vadd.f32 1.0, %v2760_v56 }
 0x72b   :  { %v2762_v58 = vpop.eup %2761 }
 0x72c   :  { %2763 = vrcp.f32 %v1913_v57  ;;  %v1923_v60 = vadd.f32 1.0, %v2762_v58 }
 0x72e   :  { %2765 = vrcp.f32 %v1923_v60 }
 0x739   :  { %v2764_v63 = vpop.eup %2763 }
 0x73a   :  { %v1926_v0 = vmul.f32 %v2764_v63, %v1906_v62 }
 0x73b   :  { %v2766_v5 = vpop.eup %2765 }
 0x73c   :  { %v1929_v3 = vadd.f32 %v1927_v1, %v1926_v0  ;;  %v1931_v6 = vsub.f32 1.0, %v2766_v5  ;;  %v1933_v9 = vmul.f32 %v2766_v5, %v3714_v17 }
 0x73e   :  { %2767 = vtanh.f32 %v1929_v3 }
 0x74b   :  { %v2768_v7 = vpop.eup %2767 }
 0x74c   :  { %v1932_v8 = vmul.f32 %v2768_v7, %v1931_v6 }
 0x74e   :  { %v1934_v13 = vadd.f32 %v1933_v9, %v1932_v8 }
 0x750   :  { %1935 = vst [vmem:[#allocation4 + $0x6] sm:$0x1] %v1934_v13  ;;  %2068 = vmatmul.mubr.f32.vlgmr.msra.gmra.mxu0 %v1934_v13  ;;  %2678 = vmatmul.mubr.f32.vlgmr.msra.gmra.mxu1 %v1934_v13 }
 0x810   :  { %v2069_v2 = vpop.f32.mrf.mxu0  ;;  %v2140_v32 = vpop.f32.mrf.mxu1 }
 0x811   :  { %v2070_v10 = vadd.f32 %v2069_v2, %v1991_v61  ;;  %v2141_v11 = vadd.f32 %v2140_v32, %v1999_v26 }
 0x812   :  { %v2071_v15 = vpop.f32.mrf.mxu0  ;;  %v2679_v27 = vpop.f32.mrf.mxu1 }
 0x813   :  { %v2144_v22 = vadd.f32 %v2070_v10, %v1937_v20  ;;  %v2072_v12 = vadd.f32 %v2071_v15, %v1995_v29 }
 0x815   :  { %v2210_v14 = vmul.f32 -1.442695, %v2144_v22  ;;  %v2154_v23 = vadd.f32 %v2152_v21, %v2072_v12 }
 0x817   :  { %2769 = vpow2.f32 %v2210_v14  ;;  %v2211_v4 = vmul.f32 -1.442695, %v2154_v23 }
 0x819   :  { %2771 = vpow2.f32 %v2211_v4 }
 0x824   :  { %v2770_v24 = vpop.eup %2769 }
 0x825   :  { %v2148_v19 = vadd.f32 1.0, %v2770_v24 }
 0x826   :  { %v2772_v25 = vpop.eup %2771 }
 0x827   :  { %2773 = vrcp.f32 %v2148_v19  ;;  %v2158_v18 = vadd.f32 1.0, %v2772_v25 }
 0x829   :  { %2775 = vrcp.f32 %v2158_v18 }
 0x834   :  { %v2774_v17 = vpop.eup %2773 }
 0x835   :  { %v2161_v30 = vmul.f32 %v2774_v17, %v2141_v11 }
 0x836   :  { %v2776_v48 = vpop.eup %2775 }
 0x837   :  { %v2164_v34 = vadd.f32 %v2162_v31, %v2161_v30  ;;  %v2166_v49 = vsub.f32 1.0, %v2776_v48  ;;  %v2168_v40 = vmul.f32 %v2776_v48, %v1934_v13 }
 0x839   :  { %2777 = vtanh.f32 %v2164_v34 }
 0x846   :  { %v2778_v50 = vpop.eup %2777 }
 0x847   :  { %v2167_v33 = vmul.f32 %v2778_v50, %v2166_v49 }
 0x849   :  { %v2169_v44 = vadd.f32 %v2168_v40, %v2167_v33 }
 0x84b   :  { %2170 = vst [vmem:[#allocation4 + $0x7] sm:$0x1] %v2169_v44 }
 0x852   :  { %v2171_v45 = vld [vmem:[#allocation4] sm:$0xff] }
 0x853   :  { %2172 = vst [vmem:[#allocation13] sm:$0xff] %v2171_v45 }
 0x854   :  { %2858 = shalt.err (!%p2855_p6)
}
 0x855   :  { %2182 = dma.vmem_to_hbm [thread:$0]  %s2180_s17, 128, %s3807_s7, [#allocation9]  }
 0x856   :  { %2877 = dma.done.wait [#allocation9], 128  }
 0x857   :  { %2878 = vsyncadd [#allocation9], 4294967168 }
 0x858   :  { %2186 = vsyncpa [#allocation8], 1 }
 0x859   :  { %2187 = vsyncpa [#allocation11], 1 }
 0x85a   :  { %2188 = vsyncpa [#allocation9], 1 }

</bundles_post_ra>
